<compile_context>
chip_gen: v6e
topology: v6e:2x2x1
jax: 0.10.0
libtpu: 0.0.40
codegen_flags: <defaults>
</compile_context>

<pallas_src>
import functools

import jax
import jax.numpy as jnp
from jax.experimental import pallas as pl
from jax.experimental.pallas import tpu as pltpu


def _round_up(x: int, m: int) -> int:
    return ((x + m - 1) // m) * m


def _conv_head_kernel(x_ref, w1_ref, scale_ref, shift_ref, w2_ref, b2_ref,
                      o_ref, *, row_shifts, activation: str):
    """One grid step: a block of whole samples; rows = (n, h, w), lanes = channels."""
    x32 = x_ref[...].astype(jnp.float32)              # (tm, C); HBM stream stays bf16
    tm = x32.shape[0]
    cp = w1_ref.shape[2]

    # Halo rows so every tap shift is a plain static row-slice.  Halo content only
    # feeds rows whose (h, w) lie outside the VALID conv output (discarded in the
    # wrapper), so its values are irrelevant.
    halo = min(tm, _round_up(max(row_shifts), 8)) if max(row_shifts) > 0 else 0
    x_ext = jnp.concatenate([x32, x32[:halo, :]], axis=0) if halo else x32

    # conv1 (4x4, stride 1, VALID): 16 accumulated MXU matmuls over row-shifted
    # views of the channel slab -- in-kernel im2col, no blown-up patches in HBM.
    acc = jnp.zeros((tm, cp), dtype=jnp.float32)
    for t, d in enumerate(row_shifts):
        xt = x_ext[d:d + tm, :] if d else x32
        acc = acc + jnp.dot(xt.astype(jnp.bfloat16), w1_ref[t],
                            preferred_element_type=jnp.float32)

    # conv1 bias + BatchNorm2d (eval) folded into a per-channel affine.
    h = acc * scale_ref[...] + shift_ref[...]
    if activation == "tanh":
        h = jnp.tanh(h)                                # EUP slot
    else:                                              # LeakyReLU(0.01), PyTorch default
        h = jnp.where(h >= 0.0, h, 0.01 * h)           # VPU select

    # conv2 (1x1) as a second MXU matmul, bias added in f32.
    o = jnp.dot(h.astype(jnp.bfloat16), w2_ref[...],
                preferred_element_type=jnp.float32) + b2_ref[...]
    o_ref[...] = o.astype(o_ref.dtype)


def _pick_samples_per_block(n: int, hw: int, per_sample_bytes: int,
                            target_bytes: int) -> int:
    """Whole samples per grid step: a few MiB streamed, >=2 steps, rows % 8 == 0."""
    cap = max(1, min(n, target_bytes // max(per_sample_bytes, 1)))
    if n > 1:
        cap = min(cap, -(-n // 2))     # >= 2 grid steps so both v7x TCs get work
    best = None
    for nb in range(cap, 0, -1):
        if (nb * hw) % 8:
            continue                   # block row count must be a multiple of 8
        if n % nb == 0:
            return nb                  # prefer an exact divisor (no ragged tail)
        if best is None:
            best = nb
    return best if best is not None else n   # nb == n: full-dim block (exempt)


def wae_conv_head_forward(x, conv1_w, conv1_b, bn_gamma, bn_beta, bn_mean,
                          bn_var, conv2_w, conv2_b, *,
                          activation: str = "leaky_relu",
                          bn_eps: float = 1e-5) -> jax.Array:
    """Forward pass of WAEConvHead on NCHW input `x`. Returns (N, C*OH*OW)."""
    N, C, H, W = x.shape
    KH, KW = conv1_w.shape[2], conv1_w.shape[3]
    OH, OW = H - KH + 1, W - KW + 1
    HW = H * W
    R = N * HW                              # rows computed by the kernel (all positions)
    Cp = _round_up(C, 128)                  # lane-dense channel dim (pads 64 -> 128)

    # rows = (n, h, w), lanes = channels; streamed operand cast to bf16 (halves HBM
    # read, MXU-native).  One fused XLA relayout+cast pass over x.
    x_rows = jnp.transpose(x, (0, 2, 3, 1)).reshape(R, C).astype(jnp.bfloat16)

    # Per-tap conv1 weights, tap order t = kh*KW + kw, output channels padded to Cp.
    w1_taps = jnp.transpose(conv1_w, (2, 3, 1, 0)).reshape(KH * KW, C, C)
    w1_taps = jnp.pad(w1_taps, ((0, 0), (0, 0), (0, Cp - C))).astype(jnp.bfloat16)

    # conv1 bias + eval-mode BatchNorm folded into per-channel scale/shift (pads = 0).
    inv_std = 1.0 / jnp.sqrt(bn_var.astype(jnp.float32) + bn_eps)
    scale = bn_gamma.astype(jnp.float32) * inv_std
    shift = (conv1_b.astype(jnp.float32) - bn_mean.astype(jnp.float32)) * scale \
        + bn_beta.astype(jnp.float32)
    scale2d = jnp.pad(scale.reshape(1, C), ((0, 0), (0, Cp - C)))
    shift2d = jnp.pad(shift.reshape(1, C), ((0, 0), (0, Cp - C)))

    # 1x1 conv weights/bias; zero rows/cols keep the pad channels exactly zero.
    w2_mat = jnp.transpose(conv2_w[:, :, 0, 0], (1, 0))              # (Cin, Cout)
    w2_mat = jnp.pad(w2_mat, ((0, Cp - C), (0, Cp - C))).astype(jnp.bfloat16)
    b2_2d = jnp.pad(conv2_b.astype(jnp.float32).reshape(1, C), ((0, 0), (0, Cp - C)))

    # Tiling: whole samples per grid step, targeting a few MiB of streamed data.
    per_sample_stream = HW * (C * 2 + Cp * 4)          # bf16 in + f32 out per sample
    nb = _pick_samples_per_block(N, HW, per_sample_stream, target_bytes=6 << 20)
    tm = nb * HW
    grid = (pl.cdiv(N, nb),)

    row_shifts = tuple(kh * W + kw for kh in range(KH) for kw in range(KW))

    in_block = tm * C * 2
    out_block = tm * Cp * 4
    w_bytes = w1_taps.size * 2 + w2_mat.size * 2 + 3 * Cp * 4
    vmem_limit = int(min(48 << 20,
                         max(24 << 20, 6 * (in_block + out_block) + 4 * w_bytes)))

    # Single-buffer the resident weight blocks only when they are big (s >= 2);
    # at s = 1 they are ~300 KB and default double-buffering is negligible.
    single_buffer_weights = w_bytes >= (1 << 20)

    def _resident(shape):
        idx = lambda i: tuple(0 for _ in shape)
        if single_buffer_weights:
            return pl.BlockSpec(shape, idx, pipeline_mode=pl.Buffered(1))
        return pl.BlockSpec(shape, idx)

    cost = pl.CostEstimate(
        flops=R * (KH * KW * 2 * C * Cp + 2 * Cp * Cp),
        transcendentals=R * Cp if activation == "tanh" else 0,
        bytes_accessed=x_rows.size * 2 + R * Cp * 4 + int(w_bytes),
    )

    out_full = pl.pallas_call(
        functools.partial(_conv_head_kernel, row_shifts=row_shifts,
                          activation=activation),
        out_shape=jax.ShapeDtypeStruct((R, Cp), x.dtype),
        grid_spec=pltpu.PrefetchScalarGridSpec(
            num_scalar_prefetch=0,
            grid=grid,
            in_specs=[
                pl.BlockSpec((tm, C), lambda i: (i, 0)),      # x rows (streamed, bf16)
                _resident((KH * KW, C, Cp)),                  # conv1 tap weights
                _resident((1, Cp)),                           # BN scale
                _resident((1, Cp)),                           # BN shift (+conv1 bias)
                _resident((Cp, Cp)),                          # conv2 weights
                _resident((1, Cp)),                           # conv2 bias
            ],
            out_specs=pl.BlockSpec((tm, Cp), lambda i: (i, 0)),
        ),
        compiler_params=pltpu.CompilerParams(
            dimension_semantics=("parallel",),
            vmem_limit_bytes=vmem_limit,
        ),
        cost_estimate=cost,
    )(x_rows, w1_taps, scale2d, shift2d, w2_mat, b2_2d)

    # Keep only VALID conv positions / real channels and flatten in PyTorch NCHW
    # order.  One fused XLA slice+transpose+reshape pass.
    out = out_full.reshape(N, H, W, Cp)[:, :OH, :OW, :C]
    out = jnp.transpose(out, (0, 3, 1, 2)).reshape(N, C * OH * OW)
    return out


def _reference_forward(x, conv1_w, conv1_b, bn_gamma, bn_beta, bn_mean, bn_var,
                       conv2_w, conv2_b, *, activation: str, bn_eps: float = 1e-5):
    dn = ("NCHW", "OIHW", "NCHW")
    hp = jax.lax.Precision.HIGHEST
    y = jax.lax.conv_general_dilated(x, conv1_w, (1, 1), "VALID",
                                     dimension_numbers=dn, precision=hp)
    y = y + conv1_b[None, :, None, None]
    inv_std = 1.0 / jnp.sqrt(bn_var + bn_eps)
    y = ((y - bn_mean[None, :, None, None]) * (bn_gamma * inv_std)[None, :, None, None]
         + bn_beta[None, :, None, None])
    y = jnp.tanh(y) if activation == "tanh" else jnp.where(y >= 0.0, y, 0.01 * y)
    y = jax.lax.conv_general_dilated(y, conv2_w, (1, 1), "VALID",
                                     dimension_numbers=dn, precision=hp)
    y = y + conv2_b[None, :, None, None]
    return y.reshape(y.shape[0], -1)


if __name__ == "__main__":
    key = jax.random.PRNGKey(0)
    ks = jax.random.split(key, 9)

    s = 1
    C = 64 * s                      # module requires channels = 64*s
    N, H, W = 2, 8, 8               # 4x4 VALID conv -> 5x5 output map

    x = jax.random.normal(ks[0], (N, C, H, W), dtype=jnp.float32)
    conv1_w = 0.05 * jax.random.normal(ks[1], (C, C, 4, 4), dtype=jnp.float32)
    conv1_b = 0.10 * jax.random.normal(ks[2], (C,), dtype=jnp.float32)
    bn_gamma = 1.0 + 0.1 * jax.random.normal(ks[3], (C,), dtype=jnp.float32)
    bn_beta = 0.10 * jax.random.normal(ks[4], (C,), dtype=jnp.float32)
    bn_mean = 0.10 * jax.random.normal(ks[5], (C,), dtype=jnp.float32)
    bn_var = jax.random.uniform(ks[6], (C,), dtype=jnp.float32, minval=0.5, maxval=1.5)
    conv2_w = 0.10 * jax.random.normal(ks[7], (C, C, 1, 1), dtype=jnp.float32)
    conv2_b = 0.10 * jax.random.normal(ks[8], (C,), dtype=jnp.float32)

    OH, OW = H - 3, W - 3
    params = (x, conv1_w, conv1_b, bn_gamma, bn_beta, bn_mean, bn_var,
              conv2_w, conv2_b)

    for act in ("leaky_relu", "tanh"):
        y = wae_conv_head_forward(*params, activation=act)
        y = jax.block_until_ready(y)
        ref = _reference_forward(*params, activation=act)

        assert y.shape == (N, C * OH * OW) and y.dtype == x.dtype
        err = jnp.abs(y - ref)
        rel_max = float(jnp.max(err) / (jnp.max(jnp.abs(ref)) + 1e-6))
        rel_mean = float(jnp.mean(err) / (jnp.mean(jnp.abs(ref)) + 1e-6))
        # bf16 MXU inputs with f32 accumulation -> expected error ~2-4e-3; gate with
        # margin but much tighter than the old 2e-2 "anything goes" check.
        assert rel_max < 1.5e-2, f"[{act}] max relative error too large: {rel_max}"
        assert rel_mean < 8e-3, f"[{act}] mean relative error too large: {rel_mean}"

    print("KERNEL_OK")
</pallas_src>

<mosaic_0001>
module attributes {stable_mosaic.version = 11 : i64} {
  func.func @_conv_head_kernel(%arg0: i32, %arg1: memref<64x64xbf16, #tpu.memory_space<vmem>>, %arg2: memref<16x64x128xbf16, #tpu.memory_space<vmem>>, %arg3: memref<1x128xf32, #tpu.memory_space<vmem>>, %arg4: memref<1x128xf32, #tpu.memory_space<vmem>>, %arg5: memref<128x128xbf16, #tpu.memory_space<vmem>>, %arg6: memref<1x128xf32, #tpu.memory_space<vmem>>, %arg7: memref<64x128xf32, #tpu.memory_space<vmem>>) attributes {dimension_semantics = [#tpu.dimension_semantics<parallel>], iteration_bounds = array<i64: 2>, scalar_prefetch = 0 : i64, scratch_operands = 0 : i64, tpu.core_type = #tpu.core_type<tc>, window_params = [{transform_indices = @transform_0, window_bounds = array<i64: 64, 64>}, {pipeline_mode = #tpu.pipeline_mode<synchronous>, transform_indices = @transform_1, window_bounds = array<i64: 16, 64, 128>}, {pipeline_mode = #tpu.pipeline_mode<synchronous>, transform_indices = @transform_2, window_bounds = array<i64: 1, 128>}, {pipeline_mode = #tpu.pipeline_mode<synchronous>, transform_indices = @transform_3, window_bounds = array<i64: 1, 128>}, {pipeline_mode = #tpu.pipeline_mode<synchronous>, transform_indices = @transform_4, window_bounds = array<i64: 128, 128>}, {pipeline_mode = #tpu.pipeline_mode<synchronous>, transform_indices = @transform_5, window_bounds = array<i64: 1, 128>}, {transform_indices = @transform_6, window_bounds = array<i64: 64, 128>}]} {
    %c0 = arith.constant 0 : index
    %c0_0 = arith.constant 0 : index
    %0 = vector.load %arg1[%c0, %c0_0] : memref<64x64xbf16, #tpu.memory_space<vmem>>, vector<64x64xbf16>
    %1 = arith.extf %0 : vector<64x64xbf16> to vector<64x64xf32>
    %2 = vector.extract_strided_slice %1 {offsets = [0, 0], sizes = [32, 64], strides = [1, 1]} : vector<64x64xf32> to vector<32x64xf32>
    %3 = tpu.concatenate %1, %2 in 0 : vector<64x64xf32>, vector<32x64xf32> -> vector<96x64xf32>
    %cst = arith.constant 0.000000e+00 : f32
    %4 = vector.broadcast %cst : f32 to vector<64x128xf32>
    %5 = arith.truncf %1 : vector<64x64xf32> to vector<64x64xbf16>
    %c0_1 = arith.constant 0 : index
    %c0_2 = arith.constant 0 : index
    %c0_3 = arith.constant 0 : index
    %6 = vector.load %arg2[%c0_1, %c0_2, %c0_3] : memref<16x64x128xbf16, #tpu.memory_space<vmem>>, vector<1x64x128xbf16>
    %7 = vector.shape_cast %6 : vector<1x64x128xbf16> to vector<64x128xbf16>
    %cst_4 = arith.constant dense<0.000000e+00> : vector<64x128xf32>
    %8 = tpu.matmul %5, %7, %cst_4 {dimension_numbers = #tpu.dot_dimension_numbers<[1], [0], [0], [1], [0, 0, 1, 1], [], []>} : vector<64x64xbf16>, vector<64x128xbf16>, vector<64x128xf32> -> vector<64x128xf32>
    %9 = arith.addf %4, %8 : vector<64x128xf32>
    %10 = vector.extract_strided_slice %3 {offsets = [1, 0], sizes = [64, 64], strides = [1, 1]} : vector<96x64xf32> to vector<64x64xf32>
    %11 = arith.truncf %10 : vector<64x64xf32> to vector<64x64xbf16>
    %c1 = arith.constant 1 : index
    %c0_5 = arith.constant 0 : index
    %c0_6 = arith.constant 0 : index
    %12 = vector.load %arg2[%c1, %c0_5, %c0_6] : memref<16x64x128xbf16, #tpu.memory_space<vmem>>, vector<1x64x128xbf16>
    %13 = vector.shape_cast %12 : vector<1x64x128xbf16> to vector<64x128xbf16>
    %cst_7 = arith.constant dense<0.000000e+00> : vector<64x128xf32>
    %14 = tpu.matmul %11, %13, %cst_7 {dimension_numbers = #tpu.dot_dimension_numbers<[1], [0], [0], [1], [0, 0, 1, 1], [], []>} : vector<64x64xbf16>, vector<64x128xbf16>, vector<64x128xf32> -> vector<64x128xf32>
    %15 = arith.addf %9, %14 : vector<64x128xf32>
    %16 = vector.extract_strided_slice %3 {offsets = [2, 0], sizes = [64, 64], strides = [1, 1]} : vector<96x64xf32> to vector<64x64xf32>
    %17 = arith.truncf %16 : vector<64x64xf32> to vector<64x64xbf16>
    %c2 = arith.constant 2 : index
    %c0_8 = arith.constant 0 : index
    %c0_9 = arith.constant 0 : index
    %18 = vector.load %arg2[%c2, %c0_8, %c0_9] : memref<16x64x128xbf16, #tpu.memory_space<vmem>>, vector<1x64x128xbf16>
    %19 = vector.shape_cast %18 : vector<1x64x128xbf16> to vector<64x128xbf16>
    %cst_10 = arith.constant dense<0.000000e+00> : vector<64x128xf32>
    %20 = tpu.matmul %17, %19, %cst_10 {dimension_numbers = #tpu.dot_dimension_numbers<[1], [0], [0], [1], [0, 0, 1, 1], [], []>} : vector<64x64xbf16>, vector<64x128xbf16>, vector<64x128xf32> -> vector<64x128xf32>
    %21 = arith.addf %15, %20 : vector<64x128xf32>
    %22 = vector.extract_strided_slice %3 {offsets = [3, 0], sizes = [64, 64], strides = [1, 1]} : vector<96x64xf32> to vector<64x64xf32>
    %23 = arith.truncf %22 : vector<64x64xf32> to vector<64x64xbf16>
    %c3 = arith.constant 3 : index
    %c0_11 = arith.constant 0 : index
    %c0_12 = arith.constant 0 : index
    %24 = vector.load %arg2[%c3, %c0_11, %c0_12] : memref<16x64x128xbf16, #tpu.memory_space<vmem>>, vector<1x64x128xbf16>
    %25 = vector.shape_cast %24 : vector<1x64x128xbf16> to vector<64x128xbf16>
    %cst_13 = arith.constant dense<0.000000e+00> : vector<64x128xf32>
    %26 = tpu.matmul %23, %25, %cst_13 {dimension_numbers = #tpu.dot_dimension_numbers<[1], [0], [0], [1], [0, 0, 1, 1], [], []>} : vector<64x64xbf16>, vector<64x128xbf16>, vector<64x128xf32> -> vector<64x128xf32>
    %27 = arith.addf %21, %26 : vector<64x128xf32>
    %28 = vector.extract_strided_slice %3 {offsets = [8, 0], sizes = [64, 64], strides = [1, 1]} : vector<96x64xf32> to vector<64x64xf32>
    %29 = arith.truncf %28 : vector<64x64xf32> to vector<64x64xbf16>
    %c4 = arith.constant 4 : index
    %c0_14 = arith.constant 0 : index
    %c0_15 = arith.constant 0 : index
    %30 = vector.load %arg2[%c4, %c0_14, %c0_15] : memref<16x64x128xbf16, #tpu.memory_space<vmem>>, vector<1x64x128xbf16>
    %31 = vector.shape_cast %30 : vector<1x64x128xbf16> to vector<64x128xbf16>
    %cst_16 = arith.constant dense<0.000000e+00> : vector<64x128xf32>
    %32 = tpu.matmul %29, %31, %cst_16 {dimension_numbers = #tpu.dot_dimension_numbers<[1], [0], [0], [1], [0, 0, 1, 1], [], []>} : vector<64x64xbf16>, vector<64x128xbf16>, vector<64x128xf32> -> vector<64x128xf32>
    %33 = arith.addf %27, %32 : vector<64x128xf32>
    %34 = vector.extract_strided_slice %3 {offsets = [9, 0], sizes = [64, 64], strides = [1, 1]} : vector<96x64xf32> to vector<64x64xf32>
    %35 = arith.truncf %34 : vector<64x64xf32> to vector<64x64xbf16>
    %c5 = arith.constant 5 : index
    %c0_17 = arith.constant 0 : index
    %c0_18 = arith.constant 0 : index
    %36 = vector.load %arg2[%c5, %c0_17, %c0_18] : memref<16x64x128xbf16, #tpu.memory_space<vmem>>, vector<1x64x128xbf16>
    %37 = vector.shape_cast %36 : vector<1x64x128xbf16> to vector<64x128xbf16>
    %cst_19 = arith.constant dense<0.000000e+00> : vector<64x128xf32>
    %38 = tpu.matmul %35, %37, %cst_19 {dimension_numbers = #tpu.dot_dimension_numbers<[1], [0], [0], [1], [0, 0, 1, 1], [], []>} : vector<64x64xbf16>, vector<64x128xbf16>, vector<64x128xf32> -> vector<64x128xf32>
    %39 = arith.addf %33, %38 : vector<64x128xf32>
    %40 = vector.extract_strided_slice %3 {offsets = [10, 0], sizes = [64, 64], strides = [1, 1]} : vector<96x64xf32> to vector<64x64xf32>
    %41 = arith.truncf %40 : vector<64x64xf32> to vector<64x64xbf16>
    %c6 = arith.constant 6 : index
    %c0_20 = arith.constant 0 : index
    %c0_21 = arith.constant 0 : index
    %42 = vector.load %arg2[%c6, %c0_20, %c0_21] : memref<16x64x128xbf16, #tpu.memory_space<vmem>>, vector<1x64x128xbf16>
    %43 = vector.shape_cast %42 : vector<1x64x128xbf16> to vector<64x128xbf16>
    %cst_22 = arith.constant dense<0.000000e+00> : vector<64x128xf32>
    %44 = tpu.matmul %41, %43, %cst_22 {dimension_numbers = #tpu.dot_dimension_numbers<[1], [0], [0], [1], [0, 0, 1, 1], [], []>} : vector<64x64xbf16>, vector<64x128xbf16>, vector<64x128xf32> -> vector<64x128xf32>
    %45 = arith.addf %39, %44 : vector<64x128xf32>
    %46 = vector.extract_strided_slice %3 {offsets = [11, 0], sizes = [64, 64], strides = [1, 1]} : vector<96x64xf32> to vector<64x64xf32>
    %47 = arith.truncf %46 : vector<64x64xf32> to vector<64x64xbf16>
    %c7 = arith.constant 7 : index
    %c0_23 = arith.constant 0 : index
    %c0_24 = arith.constant 0 : index
    %48 = vector.load %arg2[%c7, %c0_23, %c0_24] : memref<16x64x128xbf16, #tpu.memory_space<vmem>>, vector<1x64x128xbf16>
    %49 = vector.shape_cast %48 : vector<1x64x128xbf16> to vector<64x128xbf16>
    %cst_25 = arith.constant dense<0.000000e+00> : vector<64x128xf32>
    %50 = tpu.matmul %47, %49, %cst_25 {dimension_numbers = #tpu.dot_dimension_numbers<[1], [0], [0], [1], [0, 0, 1, 1], [], []>} : vector<64x64xbf16>, vector<64x128xbf16>, vector<64x128xf32> -> vector<64x128xf32>
    %51 = arith.addf %45, %50 : vector<64x128xf32>
    %52 = vector.extract_strided_slice %3 {offsets = [16, 0], sizes = [64, 64], strides = [1, 1]} : vector<96x64xf32> to vector<64x64xf32>
    %53 = arith.truncf %52 : vector<64x64xf32> to vector<64x64xbf16>
    %c8 = arith.constant 8 : index
    %c0_26 = arith.constant 0 : index
    %c0_27 = arith.constant 0 : index
    %54 = vector.load %arg2[%c8, %c0_26, %c0_27] : memref<16x64x128xbf16, #tpu.memory_space<vmem>>, vector<1x64x128xbf16>
    %55 = vector.shape_cast %54 : vector<1x64x128xbf16> to vector<64x128xbf16>
    %cst_28 = arith.constant dense<0.000000e+00> : vector<64x128xf32>
    %56 = tpu.matmul %53, %55, %cst_28 {dimension_numbers = #tpu.dot_dimension_numbers<[1], [0], [0], [1], [0, 0, 1, 1], [], []>} : vector<64x64xbf16>, vector<64x128xbf16>, vector<64x128xf32> -> vector<64x128xf32>
    %57 = arith.addf %51, %56 : vector<64x128xf32>
    %58 = vector.extract_strided_slice %3 {offsets = [17, 0], sizes = [64, 64], strides = [1, 1]} : vector<96x64xf32> to vector<64x64xf32>
    %59 = arith.truncf %58 : vector<64x64xf32> to vector<64x64xbf16>
    %c9 = arith.constant 9 : index
    %c0_29 = arith.constant 0 : index
    %c0_30 = arith.constant 0 : index
    %60 = vector.load %arg2[%c9, %c0_29, %c0_30] : memref<16x64x128xbf16, #tpu.memory_space<vmem>>, vector<1x64x128xbf16>
    %61 = vector.shape_cast %60 : vector<1x64x128xbf16> to vector<64x128xbf16>
    %cst_31 = arith.constant dense<0.000000e+00> : vector<64x128xf32>
    %62 = tpu.matmul %59, %61, %cst_31 {dimension_numbers = #tpu.dot_dimension_numbers<[1], [0], [0], [1], [0, 0, 1, 1], [], []>} : vector<64x64xbf16>, vector<64x128xbf16>, vector<64x128xf32> -> vector<64x128xf32>
    %63 = arith.addf %57, %62 : vector<64x128xf32>
    %64 = vector.extract_strided_slice %3 {offsets = [18, 0], sizes = [64, 64], strides = [1, 1]} : vector<96x64xf32> to vector<64x64xf32>
    %65 = arith.truncf %64 : vector<64x64xf32> to vector<64x64xbf16>
    %c10 = arith.constant 10 : index
    %c0_32 = arith.constant 0 : index
    %c0_33 = arith.constant 0 : index
    %66 = vector.load %arg2[%c10, %c0_32, %c0_33] : memref<16x64x128xbf16, #tpu.memory_space<vmem>>, vector<1x64x128xbf16>
    %67 = vector.shape_cast %66 : vector<1x64x128xbf16> to vector<64x128xbf16>
    %cst_34 = arith.constant dense<0.000000e+00> : vector<64x128xf32>
    %68 = tpu.matmul %65, %67, %cst_34 {dimension_numbers = #tpu.dot_dimension_numbers<[1], [0], [0], [1], [0, 0, 1, 1], [], []>} : vector<64x64xbf16>, vector<64x128xbf16>, vector<64x128xf32> -> vector<64x128xf32>
    %69 = arith.addf %63, %68 : vector<64x128xf32>
    %70 = vector.extract_strided_slice %3 {offsets = [19, 0], sizes = [64, 64], strides = [1, 1]} : vector<96x64xf32> to vector<64x64xf32>
    %71 = arith.truncf %70 : vector<64x64xf32> to vector<64x64xbf16>
    %c11 = arith.constant 11 : index
    %c0_35 = arith.constant 0 : index
    %c0_36 = arith.constant 0 : index
    %72 = vector.load %arg2[%c11, %c0_35, %c0_36] : memref<16x64x128xbf16, #tpu.memory_space<vmem>>, vector<1x64x128xbf16>
    %73 = vector.shape_cast %72 : vector<1x64x128xbf16> to vector<64x128xbf16>
    %cst_37 = arith.constant dense<0.000000e+00> : vector<64x128xf32>
    %74 = tpu.matmul %71, %73, %cst_37 {dimension_numbers = #tpu.dot_dimension_numbers<[1], [0], [0], [1], [0, 0, 1, 1], [], []>} : vector<64x64xbf16>, vector<64x128xbf16>, vector<64x128xf32> -> vector<64x128xf32>
    %75 = arith.addf %69, %74 : vector<64x128xf32>
    %76 = vector.extract_strided_slice %3 {offsets = [24, 0], sizes = [64, 64], strides = [1, 1]} : vector<96x64xf32> to vector<64x64xf32>
    %77 = arith.truncf %76 : vector<64x64xf32> to vector<64x64xbf16>
    %c12 = arith.constant 12 : index
    %c0_38 = arith.constant 0 : index
    %c0_39 = arith.constant 0 : index
    %78 = vector.load %arg2[%c12, %c0_38, %c0_39] : memref<16x64x128xbf16, #tpu.memory_space<vmem>>, vector<1x64x128xbf16>
    %79 = vector.shape_cast %78 : vector<1x64x128xbf16> to vector<64x128xbf16>
    %cst_40 = arith.constant dense<0.000000e+00> : vector<64x128xf32>
    %80 = tpu.matmul %77, %79, %cst_40 {dimension_numbers = #tpu.dot_dimension_numbers<[1], [0], [0], [1], [0, 0, 1, 1], [], []>} : vector<64x64xbf16>, vector<64x128xbf16>, vector<64x128xf32> -> vector<64x128xf32>
    %81 = arith.addf %75, %80 : vector<64x128xf32>
    %82 = vector.extract_strided_slice %3 {offsets = [25, 0], sizes = [64, 64], strides = [1, 1]} : vector<96x64xf32> to vector<64x64xf32>
    %83 = arith.truncf %82 : vector<64x64xf32> to vector<64x64xbf16>
    %c13 = arith.constant 13 : index
    %c0_41 = arith.constant 0 : index
    %c0_42 = arith.constant 0 : index
    %84 = vector.load %arg2[%c13, %c0_41, %c0_42] : memref<16x64x128xbf16, #tpu.memory_space<vmem>>, vector<1x64x128xbf16>
    %85 = vector.shape_cast %84 : vector<1x64x128xbf16> to vector<64x128xbf16>
    %cst_43 = arith.constant dense<0.000000e+00> : vector<64x128xf32>
    %86 = tpu.matmul %83, %85, %cst_43 {dimension_numbers = #tpu.dot_dimension_numbers<[1], [0], [0], [1], [0, 0, 1, 1], [], []>} : vector<64x64xbf16>, vector<64x128xbf16>, vector<64x128xf32> -> vector<64x128xf32>
    %87 = arith.addf %81, %86 : vector<64x128xf32>
    %88 = vector.extract_strided_slice %3 {offsets = [26, 0], sizes = [64, 64], strides = [1, 1]} : vector<96x64xf32> to vector<64x64xf32>
    %89 = arith.truncf %88 : vector<64x64xf32> to vector<64x64xbf16>
    %c14 = arith.constant 14 : index
    %c0_44 = arith.constant 0 : index
    %c0_45 = arith.constant 0 : index
    %90 = vector.load %arg2[%c14, %c0_44, %c0_45] : memref<16x64x128xbf16, #tpu.memory_space<vmem>>, vector<1x64x128xbf16>
    %91 = vector.shape_cast %90 : vector<1x64x128xbf16> to vector<64x128xbf16>
    %cst_46 = arith.constant dense<0.000000e+00> : vector<64x128xf32>
    %92 = tpu.matmul %89, %91, %cst_46 {dimension_numbers = #tpu.dot_dimension_numbers<[1], [0], [0], [1], [0, 0, 1, 1], [], []>} : vector<64x64xbf16>, vector<64x128xbf16>, vector<64x128xf32> -> vector<64x128xf32>
    %93 = arith.addf %87, %92 : vector<64x128xf32>
    %94 = vector.extract_strided_slice %3 {offsets = [27, 0], sizes = [64, 64], strides = [1, 1]} : vector<96x64xf32> to vector<64x64xf32>
    %95 = arith.truncf %94 : vector<64x64xf32> to vector<64x64xbf16>
    %c15 = arith.constant 15 : index
    %c0_47 = arith.constant 0 : index
    %c0_48 = arith.constant 0 : index
    %96 = vector.load %arg2[%c15, %c0_47, %c0_48] : memref<16x64x128xbf16, #tpu.memory_space<vmem>>, vector<1x64x128xbf16>
    %97 = vector.shape_cast %96 : vector<1x64x128xbf16> to vector<64x128xbf16>
    %cst_49 = arith.constant dense<0.000000e+00> : vector<64x128xf32>
    %98 = tpu.matmul %95, %97, %cst_49 {dimension_numbers = #tpu.dot_dimension_numbers<[1], [0], [0], [1], [0, 0, 1, 1], [], []>} : vector<64x64xbf16>, vector<64x128xbf16>, vector<64x128xf32> -> vector<64x128xf32>
    %99 = arith.addf %93, %98 : vector<64x128xf32>
    %c0_50 = arith.constant 0 : index
    %c0_51 = arith.constant 0 : index
    %100 = vector.load %arg3[%c0_50, %c0_51] : memref<1x128xf32, #tpu.memory_space<vmem>>, vector<1x128xf32>
    %101 = vector.broadcast %100 : vector<1x128xf32> to vector<64x128xf32>
    %102 = arith.mulf %99, %101 : vector<64x128xf32>
    %c0_52 = arith.constant 0 : index
    %c0_53 = arith.constant 0 : index
    %103 = vector.load %arg4[%c0_52, %c0_53] : memref<1x128xf32, #tpu.memory_space<vmem>>, vector<1x128xf32>
    %104 = vector.broadcast %103 : vector<1x128xf32> to vector<64x128xf32>
    %105 = arith.addf %102, %104 : vector<64x128xf32>
    %cst_54 = arith.constant 0.000000e+00 : f32
    %106 = vector.broadcast %cst_54 : f32 to vector<64x128xf32>
    %107 = arith.cmpf oge, %105, %106 : vector<64x128xf32>
    %cst_55 = arith.constant 0.00999999977 : f32
    %108 = vector.broadcast %cst_55 : f32 to vector<64x128xf32>
    %109 = arith.mulf %108, %105 : vector<64x128xf32>
    %110 = arith.select %107, %105, %109 : vector<64x128xi1>, vector<64x128xf32>
    %111 = arith.truncf %110 : vector<64x128xf32> to vector<64x128xbf16>
    %c0_56 = arith.constant 0 : index
    %c0_57 = arith.constant 0 : index
    %112 = vector.load %arg5[%c0_56, %c0_57] : memref<128x128xbf16, #tpu.memory_space<vmem>>, vector<128x128xbf16>
    %cst_58 = arith.constant dense<0.000000e+00> : vector<64x128xf32>
    %113 = tpu.matmul %111, %112, %cst_58 {dimension_numbers = #tpu.dot_dimension_numbers<[1], [0], [0], [1], [0, 0, 1, 1], [], []>} : vector<64x128xbf16>, vector<128x128xbf16>, vector<64x128xf32> -> vector<64x128xf32>
    %c0_59 = arith.constant 0 : index
    %c0_60 = arith.constant 0 : index
    %114 = vector.load %arg6[%c0_59, %c0_60] : memref<1x128xf32, #tpu.memory_space<vmem>>, vector<1x128xf32>
    %115 = vector.broadcast %114 : vector<1x128xf32> to vector<64x128xf32>
    %116 = arith.addf %113, %115 : vector<64x128xf32>
    %c0_61 = arith.constant 0 : index
    %c0_62 = arith.constant 0 : index
    %117 = vector.load %arg7[%c0_61, %c0_62] : memref<64x128xf32, #tpu.memory_space<vmem>>, vector<64x128xf32>
    tpu.vector_store %arg7[%c0_61, %c0_62], %116 {strides = array<i32>} : memref<64x128xf32, #tpu.memory_space<vmem>>, vector<64x128xf32>,
    return
  }
  func.func @transform_0(%arg0: i32) -> (i32, i32) {
    %c0_i32 = arith.constant 0 : i32
    %c0_i32_0 = arith.constant 0 : i32
    return %arg0, %c0_i32 : i32, i32
  }
  func.func @transform_1(%arg0: i32) -> (i32, i32, i32) {
    %c0_i32 = arith.constant 0 : i32
    %c0_i32_0 = arith.constant 0 : i32
    %c0_i32_1 = arith.constant 0 : i32
    %c0_i32_2 = arith.constant 0 : i32
    return %c0_i32, %c0_i32_0, %c0_i32_1 : i32, i32, i32
  }
  func.func @transform_2(%arg0: i32) -> (i32, i32) {
    %c0_i32 = arith.constant 0 : i32
    %c0_i32_0 = arith.constant 0 : i32
    %c0_i32_1 = arith.constant 0 : i32
    return %c0_i32, %c0_i32_0 : i32, i32
  }
  func.func @transform_3(%arg0: i32) -> (i32, i32) {
    %c0_i32 = arith.constant 0 : i32
    %c0_i32_0 = arith.constant 0 : i32
    %c0_i32_1 = arith.constant 0 : i32
    return %c0_i32, %c0_i32_0 : i32, i32
  }
  func.func @transform_4(%arg0: i32) -> (i32, i32) {
    %c0_i32 = arith.constant 0 : i32
    %c0_i32_0 = arith.constant 0 : i32
    %c0_i32_1 = arith.constant 0 : i32
    return %c0_i32, %c0_i32_0 : i32, i32
  }
  func.func @transform_5(%arg0: i32) -> (i32, i32) {
    %c0_i32 = arith.constant 0 : i32
    %c0_i32_0 = arith.constant 0 : i32
    %c0_i32_1 = arith.constant 0 : i32
    return %c0_i32, %c0_i32_0 : i32, i32
  }
  func.func @transform_6(%arg0: i32) -> (i32, i32) {
    %c0_i32 = arith.constant 0 : i32
    %c0_i32_0 = arith.constant 0 : i32
    return %arg0, %c0_i32 : i32, i32
  }
}

</mosaic_0001>

<bundles_post_ra>
// kernel: tpu_custom_call.1
= control target key start
LH: loop header
LB: loop body
LE: loop exit
PB: predicated region body
PF: predicated region fallthrough
CT: control target
= control target key end

     0   :  { %11 = vsyncpa [#allocation3], 0  ;;  %s4140_s0 = inlined_call_operand.vmem [shape: bf16[128,64], index: 0, kind: input, shape index: {}]   ;;  %s4141_s1 = inlined_call_operand.hbm [shape: bf16[16,64,128], index: 1, kind: input, shape index: {}]   ;;  %s4142_s2 = inlined_call_operand.vmem [shape: f32[1,128], index: 2, kind: input, shape index: {}]   ;;  %s4143_s3 = inlined_call_operand.vmem [shape: f32[1,128], index: 3, kind: input, shape index: {}]   ;;  %s4144_s4 = inlined_call_operand.vmem [shape: bf16[128,128], index: 4, kind: input, shape index: {}]   ;;  %s4145_s5 = inlined_call_operand.vmem [shape: f32[1,128], index: 5, kind: input, shape index: {}]   ;;  %s4146_s6 = inlined_call_operand.hbm [shape: f32[128,128], index: 6, kind: output, shape index: {}]  }
   0x1   :  { %12 = vsyncpa [#allocation4], 0 }
   0x2   :  { %14 = vsyncpa [#allocation4 + $0x1], 0  ;;  %s3463_s21 = smov 0   ;;  %s3465_s22 = smov 0  }
   0x3   :  { %s3467_s23 = smov 0   ;;  %s3469_s24 = smov 0  }
   0x4 LB: > { %s3484_s25 = sadd.s32 4294967295, %s3420_s24   ;;  %s2602_s26 = sadd.s32 4294967294, %s3420_s24   ;;  %s3420_s24 = sphi %s3469_s24, %s4178_s24   ;;  %s3416_s23 = sphi %s3467_s23, %s4177_s23   ;;  %s3412_s22 = sphi %s3465_s22, %s4176_s22   ;;  %s3408_s21 = sphi %s3463_s21, %s4175_s21  }
   0x5   : > { %s3488_s27 = sadd.s32 1, %s3420_s24   ;;  %s158_s28 = sadd.s32 1, %s3416_s23 }
   0x6   : > { %s155_s29 = ssub.s32 %s3420_s24, %s3488_s27  ;;  %p168_p0 = scmp.ne.s32.totalorder %s3416_s23, %s3412_s22 }
   0x7   : > { %p156_p1 = scmp.eq.s32.totalorder %s155_s29, 0  ;;  %p169_p2 = scmp.eq.s32.totalorder %s3484_s25, 1 }
   0x8   : > { %p174_p3 = scmp.ne.s32.totalorder %s3412_s22, %s3408_s21  ;;  %p175_p4 = scmp.eq.s32.totalorder %s2602_s26, 1 }
   0x9   : > { %s3499_s30 = scalar_select %p156_p1, %s3416_s23, %s158_s28  }
   0xa   : > { %p3501_p5 = por %p169_p2, %p168_p0  ;;  %p3505_p6 = por %p175_p4, %p174_p3 }
   0xb   : > { %p2603_p7 = scmp.ge.s32.totalorder %s3420_s24, 1  ;;  %p182_p8 = scmp.lt.s32.totalorder %s3420_s24, 3 }
   0xc   : > { %s4148_s8 = scalar_select %p3505_p6, 1, 0 }
   0xd   : > { %p3206_p9 = scmp.eq.s32.totalorder %s3484_s25, 0  ;;  %p3512_p10 = pnand %p2603_p7, %p182_p8 }
   0xe   : > { %s3422_s10 = smov [#allocation2]  }
   0xf   : > { %s194_s11 = sshll.u32 %s3422_s10, 4  ;;  %p3198_p11 = pneg %p3512_p10  ;;  %s195_s11 = int_to_ptr.vmem [resolvable:$true] %s194_s11 }
  0x10   : > { %s3341_s12 = scalar_lea.vmem %s195_s11, 8192  ;;  %p3349_p3 = scmp.lt.s32.totalorder %s195_s11, %s195_s11 }
  0x11   : > { %p3199_p12 = pnand %p3206_p9, %p3198_p11  ;;  %p3342_p0 = scmp.ne.s32.totalorder %s195_s11, %s3341_s12 }
  0x12   : > { %p3350_p4 = scmp.lt.s32.totalorder %s3341_s12, %s3341_s12 }
  0x13   : > { %p3332_p13 = pneg %p3199_p12 }
  0x14   : > { %p3351_p6 = por %p3350_p4, %p3349_p3 }
  0x15   : > { %p3344_p1 = pnand %p3342_p0, %p3332_p13 }
  0x17   : > { %p3345_p2 = pneg %p3344_p1 }
  0x19   : > { %p3352_p7 = pnand %p3351_p6, %p3345_p2 }
  0x1b   : > { %3355 = shalt.err (!%p3352_p7)
}
  0x1c   : > { %s3423_s13 = smov 64   ;;  %s3424_s14 = smov 4  }
  0x1d   : > { %3201 = dma.hbm_to_vmem [thread:$0]  (!%p3199_p12), %s4141_s1, 8192, %s195_s11, [#allocation3], %s3423_s13, %s3423_s13, %s3424_s14  }
  0x1e   : > { %231 = sbr.rel (%p3512_p10) target bundleno = 616 (0x268), region = 44 }
  0x23   : > { %3399 = dma.done.wait (%p3206_p9), [#allocation3], 8192  }
  0x24   : > { %3401 = vsyncadd (%p3206_p9), [#allocation3], 4294959104  ;;  %s2609_s17 = sshll.u32 %s3484_s25, 3  ;;  %v3246_v0 = vld [vmem:[#allocation2 + $0x38] sm:$0xff]   ;;  %v3247_v1 = vld [vmem:[#allocation2 + $0x30] sm:$0xff]   ;;  %vm368_vm1 = vcmask 523264  }
  0x25   : > { %p262_p8 = scmp.lt.s32.totalorder %s2609_s17, 15  ;;  %2912 = vmatprep.subr.bf16.mxu1 %v3246_v0  ;;  %v3248_v2 = vld [vmem:[#allocation2 + $0x28] sm:$0xff]   ;;  %v3249_v10 = vld [vmem:[#allocation2 + $0x20] sm:$0xff]   ;;  %v3254_v18 = vld [vmem:[#allocation2 + $0x58] sm:$0xff]   ;;  %vm307_vm0 = vsmask.f32 7424 }
  0x26   : > { %2913 = vmatpush3.bf16.msra.mxu1 %v3246_v0  ;;  %v3256_v20 = vld [vmem:[#allocation2 + $0x50] sm:$0xff]   ;;  %2944 = vmatprep.subr.bf16.mxu0 %v3254_v18  ;;  %v3253_v28 = vld [vmem:[#allocation2 + $0x18] sm:$0xff]   ;;  %v3260_v35 = vld [vmem:[#allocation2 + $0x48] sm:$0xff]   ;;  %vm581_vm2 = vcmask 1046528   ;;  %vm709_vm3 = vsmask.f32 6400 }
  0x27   : > { %s4180_s17 = smov (!%p262_p8, %s2609_s17), 15  ;;  %2914 = vmatprep.subr.bf16.mxu1 %v3247_v1  ;;  %2945 = vmatpush3.bf16.msra.mxu0 %v3254_v18  ;;  %v3255_v39 = vld [vmem:[#allocation2 + $0x10] sm:$0xff]   ;;  %v3262_v41 = vld [vmem:[#allocation2 + $0x40] sm:$0xff]   ;;  %v3259_v48 = vld [vmem:[#allocation2 + $0x8] sm:$0xff]   ;;  %s258_s12 = sand.u32 1, %s3412_s22  }
  0x28   : > { %s2610_s18 = sshll.u32 %s4180_s17, 2  ;;  %2946 = vmatprep.subr.bf16.mxu0 %v3256_v20  ;;  %v3264_v51 = vld [vmem:[#allocation2 + $0x98] sm:$0xff]   ;;  %v3261_v57 = vld [vmem:[#allocation2] sm:$0xff]   ;;  %v3266_v60 = vld [vmem:[#allocation2 + $0x90] sm:$0xff]   ;;  %s2608_s13 = sshll.u32 %s258_s12, 6 }
  0x29   : > { %s3533_s26 = scalar_lea.vmem %s4140_s0, %s2610_s18  ;;  %v3263_v0 = vld [vmem:[#allocation2 + $0x78] sm:$0xff]   ;;  %s260_s16 = scalar_lea.vmem [#allocation5], %s2608_s13 }
  0x2a   : > { %v3536_v3 = vld [vmem:[%s3533_s26] sm:$0xf]  ;;  %v3539_v4 = vld [vmem:[%s3533_s26 + $0x4] sm:$0xf]  ;;  %v3542_v5 = vld [vmem:[%s3533_s26 + $0x8] sm:$0xf]  ;;  %2915 = vmatpush3.bf16.msra.mxu1 %v3247_v1 }
  0x2b   : > { %v3545_v6 = vld [vmem:[%s3533_s26 + $0xc] sm:$0xf]  ;;  %v3549_v7 = vcombine.low %v3536_v3, %v3539_v4  ;;  %v3552_v8 = vld [vmem:[%s3533_s26 + $0x10] sm:$0xf]  ;;  %v3555_v9 = vld [vmem:[%s3533_s26 + $0x14] sm:$0xf]  ;;  %2916 = vmatprep.subr.bf16.mxu1 %v3248_v2  ;;  %v3576_v23 = vcombine.low %v3536_v3, %v3536_v3  ;;  %2947 = vmatpush3.bf16.msra.mxu0 %v3256_v20  ;;  %v3660_v20 = vcombine.low %v3539_v4, %v3542_v5 }
  0x2c   : > { %v3559_v11 = vcombine.low %v3542_v5, %v3545_v6  ;;  %v3563_v12 = vcombine.low %v3552_v8, %v3555_v9  ;;  %v3581_v25 = vld [vmem:[%s3533_s26 + $0x18] sm:$0xf]  ;;  %v3584_v26 = vld [vmem:[%s3533_s26 + $0x1c] sm:$0xf]  ;;  %2948 = vmatprep.subr.bf16.mxu0 %v3260_v35  ;;  %s2528_s17 = sshll.u32 %s260_s16, 4  ;;  %s2771_s18 = sshll.u32 %s3484_s25, 10  ;;  %s4091_s17 = int_to_ptr.vmem [resolvable:$true] %s2528_s17 }
  0x2d   : > { %v309_v13 = vshrl.u32 %v3549_v7, 16  ;;  %v311_v14 = vshll.u32 %v3549_v7, 16  ;;  %v3590_v29 = vcombine.low %v3581_v25, %v3584_v26  ;;  %v340_v34 = vshll.u32 %v3576_v23, 16  ;;  %s4096_s26 = scalar_lea.hbm %s4146_s6, %s2771_s18  ;;  %s4100_s28 = scalar_lea.sflag [#allocation4], %s258_s12 }
  0x2e   : > { %v316_v15 = vshll.u32 %v3559_v11, 16  ;;  %v320_v16 = vshrl.u32 %v3559_v11, 16  ;;  %v324_v17 = vshll.u32 %v3563_v12, 16  ;;  %2917 = vmatpush3.bf16.msra.mxu1 %v3248_v2  ;;  %v328_v30 = vshrl.u32 %v3563_v12, 16  ;;  %s3356_s25 = scalar_lea.vmem %s4091_s17, 1024  ;;  %s3425_s29 = smov [#allocation5]  }
  0x2f   : > { %v313_v19 = vrot.slane %v311_v14, 1  ;;  %2918 = vmatprep.subr.bf16.mxu1 %v3249_v10  ;;  %v332_v33 = vshll.u32 %v3590_v29, 16  ;;  %v336_v37 = vshrl.u32 %v3590_v29, 16  ;;  %v3605_v38 = vrot.slane %v3549_v7, 1  ;;  %2949 = vmatpush3.bf16.msra.mxu0 %v3260_v35  ;;  %p3357_p6 = scmp.ne.s32.totalorder %s4091_s17, %s3356_s25  ;;  %s3360_s9 = sshll.u32 %s3425_s29, 4  ;;  %s3361_s9 = int_to_ptr.vmem [resolvable:$false] %s3360_s9 }
  0x30   : > { %v318_v21 = vrot.slane %v316_v15, 1  ;;  %v326_v22 = vrot.slane %v324_v17, 1  ;;  %v583_v42 = vrot.slane %v3559_v11, 1  ;;  %v342_v45 = vrot.slane %v340_v34, 1  ;;  %2950 = vmatprep.subr.bf16.mxu0 %v3262_v41  ;;  %s3362_s10 = scalar_lea.vmem %s3361_s9, 2048  ;;  %p3363_p11 = scmp.lt.s32.totalorder %s4091_s17, %s3361_s9 }
  0x31   : > { %v3578_v24 = vor.u32 %v313_v19, %v309_v13  ;;  %v334_v40 = vrot.slane %v332_v33, 1  ;;  %v587_v47 = vrot.slane %v3590_v29, 1  ;;  %v585_v50 = vrot.slane %v3563_v12, 1  ;;  %p3358_p9 = pnand %p3357_p6, %p3501_p5  ;;  %p3364_p12 = scmp.lt.s32.totalorder %s3362_s10, %s3356_s25 }
  0x32   : > { %v322_v27 = vor.u32 %v320_v16, %v318_v21  ;;  %v330_v32 = vor.u32 %v328_v30, %v326_v22  ;;  %2919 = vmatpush3.bf16.msra.mxu1 %v3249_v10  ;;  %v584_v46 = vsel %vm581_vm2, %v3605_v38, %v583_v42  ;;  %v710_v53 = vrot.slane %v309_v13, 1  ;;  %v3268_v10 = vld [vmem:[#allocation2 + $0x88] sm:$0xff]  }
  0x33   : > { %v319_v31 = vsel %vm307_vm0, %v3578_v24, %v318_v21  ;;  %2928 = vmatprep.subr.bf16.mxu1 %v3253_v28  ;;  %v338_v44 = vor.u32 %v336_v37, %v334_v40  ;;  %2952 = vmatprep.mubr.msk.bf16.mxu0 %vm368_vm1, %v584_v46  ;;  %v3627_v52 = vsel %vm581_vm2, %v587_v47, %v3605_v38  ;;  %v711_v54 = vrot.slane %v311_v14, 2  ;;  %v3265_v14 = vld [vmem:[#allocation2 + $0x70] sm:$0xff]   ;;  %v3270_v21 = vld [vmem:[#allocation2 + $0x80] sm:$0xff]   ;;  %p3359_p10 = pneg %p3358_p9  ;;  %p3365_p13 = por %p3364_p12, %p3363_p11 }
  0x34   : > { %2920 = vmatprep.mubr.msk.bf16.mxu1 %vm368_vm1, %v319_v31  ;;  %v3601_v36 = vsel %vm307_vm0, %v322_v27, %v326_v22  ;;  %v3611_v43 = vsel %vm307_vm0, %v330_v32, %v334_v40  ;;  %v721_v56 = vrot.slane %v336_v37, 1  ;;  %2951 = vmatpush3.bf16.msra.mxu0 %v3262_v41  ;;  %v722_v58 = vrot.slane %v332_v33, 2 }
  0x35   : > { %2921 = vmatmul.mubr.msk.bf16.vlgmr.msra.gmra.mxu1 %vm368_vm1, %v3601_v36  ;;  %v3621_v49 = vsel %vm307_vm0, %v338_v44, %v313_v19  ;;  %v343_v55 = vsel %vm307_vm0, %v338_v44, %v342_v45  ;;  %v3631_v59 = vsel %vm581_vm2, %v583_v42, %v585_v50  ;;  %2976 = vmatprep.subr.bf16.mxu0 %v3264_v51  ;;  %v589_v2 = vrot.slane %v3576_v23, 1  ;;  %p3366_p0 = pnand %p3365_p13, %p3359_p10 }
  0x36   : > { %2929 = vmatpush3.bf16.msra.mxu1 %v3253_v28  ;;  %2924 = vmatprep.mubr.msk.bf16.mxu1 %vm368_vm1, %v3611_v43  ;;  %v3635_v61 = vsel %vm581_vm2, %v585_v50, %v587_v47  ;;  %v3637_v62 = vor.u32 %v711_v54, %v710_v53  ;;  %v3639_v63 = vor.u32 %v722_v58, %v721_v56  ;;  %v714_v13 = vrot.slane %v316_v15, 2 }
  0x37   : > { %2930 = vmatprep.subr.bf16.mxu1 %v3255_v39  ;;  %2953 = vmatmul.mubr.msk.bf16.vlgmr.msra.gmra.mxu0 %vm368_vm1, %v3631_v59  ;;  %v713_v18 = vrot.slane %v320_v16, 1  ;;  %v590_v19 = vsel %vm581_vm2, %v587_v47, %v589_v2  ;;  %v3668_v15 = vcombine.low %v3584_v26, %v3536_v3  ;;  %v3267_v16 = vld [vmem:[#allocation2 + $0x68] sm:$0xff]   ;;  %v974_v27 = vshll.u32 %v3660_v20, 16  ;;  %v3274_v3 = vld [vmem:[#allocation2 + $0xd8] sm:$0xff]  }
  0x38   : > { %v3648_v1 = vsel %vm709_vm3, %v3639_v63, %v3637_v62  ;;  %2977 = vmatpush3.bf16.msra.mxu0 %v3264_v51  ;;  %2956 = vmatprep.mubr.msk.bf16.mxu0 %vm368_vm1, %v3635_v61  ;;  %v718_v32 = vrot.slane %v324_v17, 2  ;;  %v3679_v26 = vrot.slane %v3660_v20, 1  ;;  %v717_v35 = vrot.slane %v328_v30, 1 }
  0x39   : > { %2978 = vmatprep.subr.bf16.mxu0 %v3266_v60  ;;  %v715_v22 = vor.u32 %v714_v13, %v713_v18  ;;  %v992_v28 = vshll.u32 %v3668_v15, 16  ;;  %v996_v31 = vshrl.u32 %v3668_v15, 16  ;;  %v3682_v33 = vrot.slane %v3668_v15, 1 }
  0x3a   : > { %2931 = vmatpush3.bf16.msra.mxu1 %v3255_v39  ;;  %v3269_v39 = vld [vmem:[#allocation2 + $0x60] sm:$0xff]   ;;  %v3692_v17 = vcombine.low %v3545_v6, %v3552_v8  ;;  %v972_v41 = vshrl.u32 %v3660_v20, 16  ;;  %v3702_v30 = vcombine.low %v3555_v9, %v3581_v25  ;;  %v976_v44 = vrot.slane %v974_v27, 1  ;;  %v3276_v8 = vld [vmem:[#allocation2 + $0xd0] sm:$0xff]   ;;  %v3271_v25 = vld [vmem:[#allocation2 + $0xb8] sm:$0xff]  }
  0x3b   : > { %2932 = vmatprep.subr.bf16.mxu1 %v3259_v48  ;;  %v3686_v37 = vrot.slane %v992_v28, 1  ;;  %v716_v40 = vsel %vm709_vm3, %v3637_v62, %v715_v22  ;;  %v3698_v42 = vsel %vm581_vm2, %v3682_v33, %v3679_v26  ;;  %v1255_v47 = vrot.slane %v974_v27, 2 }
  0x3c   : > { %2979 = vmatpush3.bf16.msra.mxu0 %v3266_v60  ;;  %v1254_v46 = vrot.slane %v972_v41, 1  ;;  %v725_v50 = vshrl.u32 %v3576_v23, 16  ;;  %v1265_v51 = vrot.slane %v996_v31, 1  ;;  %v1266_v53 = vrot.slane %v992_v28, 2  ;;  %v3277_v23 = vld [vmem:[#allocation2 + $0xa8] sm:$0xff]  }
  0x3d   : > { %2925 = vmatmul.mubr.msk.bf16.gmra.mxu1 %vm368_vm1, %v343_v55  ;;  %2980 = vmatprep.subr.bf16.mxu0 %v3268_v10  ;;  %v3705_v45 = vor.u32 %v996_v31, %v3686_v37  ;;  %v2697_v54 = vcombine.low %v3542_v5, %v3542_v5  ;;  %v3280_v55 = vld [vmem:[#allocation2 + $0xc8] sm:$0xff]   ;;  %v978_v56 = vshll.u32 %v3692_v17, 16  ;;  %v728_v5 = vrot.slane %v340_v34, 2 }
  0x3e   : > { %2933 = vmatpush3.bf16.msra.mxu1 %v3259_v48  ;;  %2936 = vmatprep.mubr.msk.bf16.mxu1 %vm368_vm1, %v3549_v7  ;;  %v719_v48 = vor.u32 %v718_v32, %v717_v35  ;;  %v3723_v58 = vor.u32 %v1255_v47, %v1254_v46  ;;  %v3725_v60 = vor.u32 %v1266_v53, %v1265_v51  ;;  %v727_v2 = vrot.slane %v725_v50, 1  ;;  %v3281_v46 = vld [vmem:[#allocation2 + $0xa0] sm:$0xff]   ;;  %v3284_v47 = vld [vmem:[#allocation2 + $0x118] sm:$0xff]  }
  0x3f   : > { %2934 = vmatprep.subr.bf16.mxu1 %v3261_v57  ;;  %2957 = vmatmul.mubr.msk.bf16.gmra.mxu0 %vm368_vm1, %v590_v19  ;;  %v3713_v9 = vsel %vm307_vm0, %v3705_v45, %v976_v44  ;;  %v3282_v19 = vld [vmem:[#allocation2 + $0xc0] sm:$0xff]   ;;  %v980_v34 = vrot.slane %v978_v56, 1  ;;  %v2730_v27 = vcombine.low %v3545_v6, %v3545_v6  ;;  %v985_v31 = vshll.u32 %v3702_v30, 16 }
  0x40   : > { %2981 = vmatpush3.bf16.msra.mxu0 %v3268_v10  ;;  %2984 = vmatprep.mubr.msk.bf16.mxu0 %vm368_vm1, %v3660_v20  ;;  %v3275_v10 = vld [vmem:[#allocation2 + $0xb0] sm:$0xff]   ;;  %v3734_v13 = vsel %vm709_vm3, %v719_v48, %v3639_v63  ;;  %v3739_v18 = vsel %vm709_vm3, %v3725_v60, %v3723_v58  ;;  %v729_v28 = vor.u32 %v728_v5, %v727_v2 }
  0x41   : > { %2982 = vmatprep.subr.bf16.mxu0 %v3270_v21  ;;  %v977_v35 = vor.u32 %v976_v44, %v972_v41  ;;  %v987_v44 = vrot.slane %v985_v31, 1  ;;  %v2088_v50 = vrot.slane %v2730_v27, 1  ;;  %v2203_v2 = vshrl.u32 %v2730_v27, 16  ;;  %v3286_v5 = vld [vmem:[#allocation2 + $0x110] sm:$0xff]  }
  0x42   : > { %2935 = vmatpush3.bf16.msra.mxu1 %v3261_v57  ;;  %v1128_v57 = vrot.slane %v3692_v17, 1  ;;  %v730_v41 = vsel %vm709_vm3, %v3639_v63, %v729_v28 }
  0x43   : > { %2960 = vmatprep.subr.bf16.mxu1 %v3263_v0  ;;  %v981_v51 = vsel %vm307_vm0, %v977_v35, %v980_v34  ;;  %v3780_v63 = vsel %vm581_vm2, %v3679_v26, %v2088_v50 }
  0x44   : > { %2983 = vmatpush3.bf16.msra.mxu0 %v3270_v21  ;;  %v1628_v21 = vrot.slane %v2697_v54, 1 }
  0x45   : > { %2937 = vmatmul.mubr.msk.bf16.vlgmr.msra.gmra.mxu1 %vm368_vm1, %v3559_v11  ;;  %3008 = vmatprep.subr.bf16.mxu0 %v3274_v3 }
  0x46   : > { %2961 = vmatpush3.bf16.msra.mxu1 %v3263_v0  ;;  %2940 = vmatprep.mubr.msk.bf16.mxu1 %vm368_vm1, %v3563_v12  ;;  %v3728_v0 = vsel %vm709_vm3, %v715_v22, %v719_v48  ;;  %v3754_v32 = vsel %vm581_vm2, %v3605_v38, %v1628_v21  ;;  %v1970_v48 = vshll.u32 %v2730_v27, 16  ;;  %v3283_v21 = vld [vmem:[#allocation2 + $0xf8] sm:$0xff]  }
  0x47   : > { %2962 = vmatprep.subr.bf16.mxu1 %v3265_v14  ;;  %2985 = vmatmul.mubr.msk.bf16.vlgmr.msra.gmra.mxu0 %vm368_vm1, %v3692_v17 }
  0x48   : > { %3009 = vmatpush3.bf16.msra.mxu0 %v3274_v3  ;;  %2988 = vmatprep.mubr.msk.bf16.mxu0 %vm368_vm1, %v3702_v30  ;;  %v1743_v3 = vshrl.u32 %v2697_v54, 16  ;;  %v1972_v53 = vrot.slane %v1970_v48, 1 }
  0x49   : > { %3010 = vmatprep.subr.bf16.mxu0 %v3276_v8 }
  0x4a   : > { %2963 = vmatpush3.bf16.msra.mxu1 %v3265_v14  ;;  %v1510_v14 = vshll.u32 %v2697_v54, 16  ;;  %v1745_v38 = vrot.slane %v1743_v3, 1 }
  0x4b   : > { %2964 = vmatprep.subr.bf16.mxu1 %v3267_v16 }
  0x4c   : > { %3011 = vmatpush3.bf16.msra.mxu0 %v3276_v8  ;;  %v1512_v22 = vrot.slane %v1510_v14, 1  ;;  %v1130_v8 = vrot.slane %v3702_v30, 1 }
  0x4d   : > { %2941 = vmatmul.mubr.msk.bf16.gmra.mxu1 %vm368_vm1, %v3590_v29  ;;  %3012 = vmatprep.subr.bf16.mxu0 %v3280_v55 }
  0x4e   : > { %2965 = vmatpush3.bf16.msra.mxu1 %v3267_v16  ;;  %2968 = vmatprep.mubr.msk.bf16.mxu1 %vm368_vm1, %v716_v40  ;;  %v1129_v16 = vsel %vm581_vm2, %v3679_v26, %v1128_v57  ;;  %v3761_v6 = vsel %vm307_vm0, %v3578_v24, %v1512_v22  ;;  %v1746_v40 = vrot.slane %v1510_v14, 2  ;;  %v3772_v54 = vsel %vm581_vm2, %v1128_v57, %v1130_v8 }
  0x4f   : > { %2966 = vmatprep.subr.bf16.mxu1 %v3269_v39  ;;  %2989 = vmatmul.mubr.msk.bf16.gmra.mxu0 %vm368_vm1, %v3668_v15  ;;  %v3788_v57 = vsel %vm307_vm0, %v977_v35, %v1972_v53  ;;  %v2206_v14 = vrot.slane %v1970_v48, 2  ;;  %v2664_v26 = vcombine.low %v3539_v4, %v3539_v4  ;;  %v3285_v4 = vld [vmem:[#allocation2 + $0xf0] sm:$0xff]   ;;  %v3290_v48 = vld [vmem:[#allocation2 + $0xe0] sm:$0xff]  }
  0x50   : > { %3013 = vmatpush3.bf16.msra.mxu0 %v3280_v55  ;;  %3016 = vmatprep.mubr.msk.bf16.mxu0 %vm368_vm1, %v1129_v16  ;;  %v1747_v24 = vor.u32 %v1746_v40, %v1745_v38 }
  0x51   : > { %3014 = vmatprep.subr.bf16.mxu0 %v3282_v19  ;;  %v1134_v22 = vrot.slane %v2664_v26, 1  ;;  %v1000_v28 = vshll.u32 %v2664_v26, 16 }
  0x52   : > { %2967 = vmatpush3.bf16.msra.mxu1 %v3269_v39  ;;  %v982_v39 = vshrl.u32 %v3692_v17, 16  ;;  %v3776_v55 = vsel %vm709_vm3, %v3637_v62, %v1747_v24 }
  0x53   : > { %2992 = vmatprep.subr.bf16.mxu1 %v3271_v25  ;;  %v1135_v38 = vsel %vm581_vm2, %v3682_v33, %v1134_v22  ;;  %v1272_v53 = vrot.slane %v1000_v28, 2 }
  0x54   : > { %3015 = vmatpush3.bf16.msra.mxu0 %v3282_v19  ;;  %v984_v62 = vor.u32 %v982_v39, %v980_v34  ;;  %v2205_v19 = vrot.slane %v2203_v2, 1  ;;  %v1257_v40 = vrot.slane %v982_v39, 1  ;;  %v3294_v2 = vld [vmem:[#allocation2 + $0x130] sm:$0xff]  }
  0x55   : > { %2969 = vmatmul.mubr.msk.bf16.vlgmr.msra.gmra.mxu1 %vm368_vm1, %v3728_v0  ;;  %3040 = vmatprep.subr.bf16.mxu0 %v3284_v47 }
  0x56   : > { %2993 = vmatpush3.bf16.msra.mxu1 %v3271_v25  ;;  %2972 = vmatprep.mubr.msk.bf16.mxu1 %vm368_vm1, %v3734_v13  ;;  %v989_v25 = vshrl.u32 %v3702_v30, 16  ;;  %v2207_v27 = vor.u32 %v2206_v14, %v2205_v19  ;;  %v3798_v34 = vsel %vm307_vm0, %v984_v62, %v987_v44  ;;  %v3296_v14 = vld [vmem:[#allocation2 + $0x128] sm:$0xff]   ;;  %v3301_v62 = vld [vmem:[#allocation2 + $0x198] sm:$0xff]   ;;  %v3298_v19 = vld [vmem:[#allocation2 + $0x120] sm:$0xff]  }
  0x57   : > { %2994 = vmatprep.subr.bf16.mxu1 %v3275_v10  ;;  %3017 = vmatmul.mubr.msk.bf16.vlgmr.msra.gmra.mxu0 %vm368_vm1, %v3772_v54 }
  0x58   : > { %v991_v16 = vor.u32 %v989_v25, %v987_v44  ;;  %3041 = vmatpush3.bf16.msra.mxu0 %v3284_v47  ;;  %v3802_v3 = vsel %vm709_vm3, %v3723_v58, %v2207_v27  ;;  %v1002_v47 = vrot.slane %v1000_v28, 1  ;;  %v1269_v44 = vshrl.u32 %v2664_v26, 16  ;;  %v3327_v27 = vld [vmem:[%s4144_s4 + $0x10] sm:$0xff]   ;;  %v3328_v28 = vld [vmem:[%s4144_s4 + $0x8] sm:$0xff]  }
  0x59   : > { %3042 = vmatprep.subr.bf16.mxu0 %v3286_v5 }
  0x5a   : > { %2995 = vmatpush3.bf16.msra.mxu1 %v3275_v10  ;;  %v3785_v10 = vsel %vm581_vm2, %v1130_v8, %v3682_v33  ;;  %v3806_v35 = vsel %vm307_vm0, %v991_v16, %v3686_v37  ;;  %v1258_v8 = vrot.slane %v978_v56, 2  ;;  %v3288_v37 = vld [vmem:[#allocation2 + $0xe8] sm:$0xff]   ;;  %v1261_v56 = vrot.slane %v989_v25, 1 }
  0x5b   : > { %2996 = vmatprep.subr.bf16.mxu1 %v3277_v23  ;;  %3020 = vmatprep.mubr.msk.bf16.mxu0 %vm368_vm1, %v3785_v10  ;;  %v1262_v33 = vrot.slane %v985_v31, 2  ;;  %v1003_v24 = vsel %vm307_vm0, %v3705_v45, %v1002_v47  ;;  %v3292_v31 = vld [vmem:[#allocation2 + $0x138] sm:$0xff]   ;;  %v3297_v45 = vld [vmem:[#allocation2 + $0x148] sm:$0xff]   ;;  %v1271_v25 = vrot.slane %v1269_v44, 1 }
  0x5c   : > { %3043 = vmatpush3.bf16.msra.mxu0 %v3286_v5  ;;  %v1259_v39 = vor.u32 %v1258_v8, %v1257_v40 }
  0x5d   : > { %2973 = vmatmul.mubr.msk.bf16.gmra.mxu1 %vm368_vm1, %v730_v41  ;;  %v3293_v41 = vld [vmem:[#allocation2 + $0x158] sm:$0xff]  }
  0x5e   : > { %2997 = vmatpush3.bf16.msra.mxu1 %v3277_v23  ;;  %3000 = vmatprep.mubr.msk.bf16.mxu1 %vm368_vm1, %v981_v51  ;;  %v3289_v23 = vld [vmem:[#allocation2 + $0x108] sm:$0xff]   ;;  %v1260_v50 = vsel %vm709_vm3, %v3723_v58, %v1259_v39  ;;  %v3295_v51 = vld [vmem:[#allocation2 + $0x150] sm:$0xff]  }
  0x5f   : > { %2998 = vmatprep.subr.bf16.mxu1 %v3281_v46  ;;  %3044 = vmatprep.subr.bf16.mxu0 %v3289_v23 }
  0x60   : > { %3021 = vmatmul.mubr.msk.bf16.gmra.mxu0 %vm368_vm1, %v1135_v38  ;;  %v3329_v38 = vld [vmem:[%s4144_s4] sm:$0xff]  }
  0x61   : > { %3045 = vmatpush3.bf16.msra.mxu0 %v3289_v23  ;;  %3048 = vmatprep.mubr.msk.bf16.mxu0 %vm368_vm1, %v3559_v11  ;;  %v1263_v11 = vor.u32 %v1262_v33, %v1261_v56 }
  0x62   : > { %2999 = vmatpush3.bf16.msra.mxu1 %v3281_v46  ;;  %v3291_v46 = vld [vmem:[#allocation2 + $0x100] sm:$0xff]  }
  0x63   : > { %3024 = vmatprep.subr.bf16.mxu1 %v3283_v21  ;;  %3046 = vmatprep.subr.bf16.mxu0 %v3291_v46  ;;  %v3832_v58 = vsel %vm709_vm3, %v1259_v39, %v1263_v11  ;;  %v3836_v5 = vsel %vm709_vm3, %v1263_v11, %v3725_v60 }
  0x65   : > { %3001 = vmatmul.mubr.msk.bf16.vlgmr.msra.gmra.mxu1 %vm368_vm1, %v3798_v34  ;;  %3047 = vmatpush3.bf16.msra.mxu0 %v3291_v46 }
  0x66   : > { %3025 = vmatpush3.bf16.msra.mxu1 %v3283_v21  ;;  %3004 = vmatprep.mubr.msk.bf16.mxu1 %vm368_vm1, %v3806_v35  ;;  %v3303_v21 = vld [vmem:[#allocation2 + $0x190] sm:$0xff]  }
  0x67   : > { %3026 = vmatprep.subr.bf16.mxu1 %v3285_v4  ;;  %3072 = vmatprep.subr.bf16.mxu0 %v3293_v41 }
  0x68   : > { %3049 = vmatmul.mubr.msk.bf16.vlgmr.msra.gmra.mxu0 %vm368_vm1, %v3563_v12  ;;  %v3299_v12 = vld [vmem:[#allocation2 + $0x140] sm:$0xff]  }
  0x69   : > { %3073 = vmatpush3.bf16.msra.mxu0 %v3293_v41  ;;  %3052 = vmatprep.mubr.msk.bf16.mxu0 %vm368_vm1, %v3590_v29  ;;  %v1273_v29 = vor.u32 %v1272_v53, %v1271_v25 }
  0x6a   : > { %3027 = vmatpush3.bf16.msra.mxu1 %v3285_v4  ;;  %3074 = vmatprep.subr.bf16.mxu0 %v3295_v51 }
  0x6b   : > { %3028 = vmatprep.subr.bf16.mxu1 %v3288_v37  ;;  %v1274_v26 = vsel %vm709_vm3, %v3725_v60, %v1273_v29  ;;  %v3302_v60 = vld [vmem:[#allocation2 + $0x170] sm:$0xff]  }
  0x6d   : > { %3005 = vmatmul.mubr.msk.bf16.gmra.mxu1 %vm368_vm1, %v1003_v24  ;;  %3075 = vmatpush3.bf16.msra.mxu0 %v3295_v51 }
  0x6e   : > { %3029 = vmatpush3.bf16.msra.mxu1 %v3288_v37  ;;  %3032 = vmatprep.mubr.msk.bf16.mxu1 %vm368_vm1, %v1260_v50 }
  0x6f   : > { %3030 = vmatprep.subr.bf16.mxu1 %v3290_v48  ;;  %3076 = vmatprep.subr.bf16.mxu0 %v3297_v45 }
  0x70   : > { %3053 = vmatmul.mubr.msk.bf16.gmra.mxu0 %vm368_vm1, %v3549_v7  ;;  %v3300_v7 = vld [vmem:[#allocation2 + $0x178] sm:$0xff]  }
  0x71   : > { %3077 = vmatpush3.bf16.msra.mxu0 %v3297_v45  ;;  %3080 = vmatprep.mubr.msk.bf16.mxu0 %vm368_vm1, %v3631_v59  ;;  %v3306_v59 = vld [vmem:[#allocation2 + $0x188] sm:$0xff]  }
  0x72   : > { %3031 = vmatpush3.bf16.msra.mxu1 %v3290_v48  ;;  %3078 = vmatprep.subr.bf16.mxu0 %v3299_v12 }
  0x73   : > { %3056 = vmatprep.subr.bf16.mxu1 %v3292_v31 }
  0x75   : > { %3033 = vmatmul.mubr.msk.bf16.vlgmr.msra.gmra.mxu1 %vm368_vm1, %v3832_v58  ;;  %3079 = vmatpush3.bf16.msra.mxu0 %v3299_v12 }
  0x76   : > { %3057 = vmatpush3.bf16.msra.mxu1 %v3292_v31  ;;  %3036 = vmatprep.mubr.msk.bf16.mxu1 %vm368_vm1, %v3836_v5 }
  0x77   : > { %3058 = vmatprep.subr.bf16.mxu1 %v3294_v2  ;;  %3104 = vmatprep.subr.bf16.mxu0 %v3301_v62 }
  0x78   : > { %3081 = vmatmul.mubr.msk.bf16.vlgmr.msra.gmra.mxu0 %vm368_vm1, %v3635_v61  ;;  %v3305_v61 = vld [vmem:[#allocation2 + $0x168] sm:$0xff]  }
  0x79   : > { %3105 = vmatpush3.bf16.msra.mxu0 %v3301_v62  ;;  %3084 = vmatprep.mubr.msk.bf16.mxu0 %vm368_vm1, %v3627_v52  ;;  %v3310_v52 = vld [vmem:[#allocation2 + $0x1d8] sm:$0xff]  }
  0x7a   : > { %3059 = vmatpush3.bf16.msra.mxu1 %v3294_v2  ;;  %3106 = vmatprep.subr.bf16.mxu0 %v3303_v21 }
  0x7b   : > { %3060 = vmatprep.subr.bf16.mxu1 %v3296_v14 }
  0x7d   : > { %3037 = vmatmul.mubr.msk.bf16.gmra.mxu1 %vm368_vm1, %v1274_v26  ;;  %3107 = vmatpush3.bf16.msra.mxu0 %v3303_v21 }
  0x7e   : > { %3061 = vmatpush3.bf16.msra.mxu1 %v3296_v14  ;;  %3064 = vmatprep.mubr.msk.bf16.mxu1 %vm368_vm1, %v3601_v36  ;;  %v3308_v36 = vld [vmem:[#allocation2 + $0x180] sm:$0xff]  }
  0x7f   : > { %3062 = vmatprep.subr.bf16.mxu1 %v3298_v19  ;;  %3108 = vmatprep.subr.bf16.mxu0 %v3306_v59 }
  0x80   : > { %3085 = vmatmul.mubr.msk.bf16.gmra.mxu0 %vm368_vm1, %v3754_v32  ;;  %v3309_v32 = vld [vmem:[#allocation2 + $0x1b8] sm:$0xff]  }
  0x81   : > { %3109 = vmatpush3.bf16.msra.mxu0 %v3306_v59  ;;  %3112 = vmatprep.mubr.msk.bf16.mxu0 %vm368_vm1, %v3692_v17  ;;  %v3314_v17 = vld [vmem:[#allocation2 + $0x1c8] sm:$0xff]  }
  0x82   : > { %3063 = vmatpush3.bf16.msra.mxu1 %v3298_v19  ;;  %3110 = vmatprep.subr.bf16.mxu0 %v3308_v36 }
  0x83   : > { %3088 = vmatprep.subr.bf16.mxu1 %v3300_v7 }
  0x85   : > { %3065 = vmatmul.mubr.msk.bf16.vlgmr.msra.gmra.mxu1 %vm368_vm1, %v3611_v43  ;;  %v3307_v43 = vld [vmem:[#allocation2 + $0x160] sm:$0xff]   ;;  %3111 = vmatpush3.bf16.msra.mxu0 %v3308_v36 }
  0x86   : > { %3089 = vmatpush3.bf16.msra.mxu1 %v3300_v7  ;;  %3068 = vmatprep.mubr.msk.bf16.mxu1 %vm368_vm1, %v3621_v49  ;;  %v3312_v49 = vld [vmem:[#allocation2 + $0x1d0] sm:$0xff]  }
  0x87   : > { %3090 = vmatprep.subr.bf16.mxu1 %v3302_v60  ;;  %3136 = vmatprep.subr.bf16.mxu0 %v3310_v52 }
  0x88   : > { %3113 = vmatmul.mubr.msk.bf16.vlgmr.msra.gmra.mxu0 %vm368_vm1, %v3702_v30  ;;  %v3313_v30 = vld [vmem:[#allocation2 + $0x1a8] sm:$0xff]  }
  0x89   : > { %3137 = vmatpush3.bf16.msra.mxu0 %v3310_v52  ;;  %3116 = vmatprep.mubr.msk.bf16.mxu0 %vm368_vm1, %v3668_v15  ;;  %v3315_v15 = vld [vmem:[#allocation2 + $0x1a0] sm:$0xff]  }
  0x8a   : > { %3091 = vmatpush3.bf16.msra.mxu1 %v3302_v60  ;;  %3138 = vmatprep.subr.bf16.mxu0 %v3312_v49 }
  0x8b   : > { %3092 = vmatprep.subr.bf16.mxu1 %v3305_v61 }
  0x8d   : > { %3069 = vmatmul.mubr.msk.bf16.gmra.mxu1 %vm368_vm1, %v3761_v6  ;;  %v3311_v6 = vld [vmem:[#allocation2 + $0x1b0] sm:$0xff]   ;;  %3139 = vmatpush3.bf16.msra.mxu0 %v3312_v49 }
  0x8e   : > { %3093 = vmatpush3.bf16.msra.mxu1 %v3305_v61  ;;  %3096 = vmatprep.mubr.msk.bf16.mxu1 %vm368_vm1, %v3728_v0  ;;  %v3316_v0 = vld [vmem:[#allocation2 + $0x1c0] sm:$0xff]  }
  0x8f   : > { %3094 = vmatprep.subr.bf16.mxu1 %v3307_v43  ;;  %3140 = vmatprep.subr.bf16.mxu0 %v3314_v17 }
  0x90   : > { %3117 = vmatmul.mubr.msk.bf16.gmra.mxu0 %vm368_vm1, %v3660_v20  ;;  %v3318_v20 = vld [vmem:[#allocation2 + $0x1f0] sm:$0xff]  }
  0x91   : > { %3141 = vmatpush3.bf16.msra.mxu0 %v3314_v17  ;;  %3144 = vmatprep.mubr.msk.bf16.mxu0 %vm368_vm1, %v3772_v54  ;;  %v3321_v54 = vld [vmem:[#allocation2 + $0x1e0] sm:$0xff]  }
  0x92   : > { %3095 = vmatpush3.bf16.msra.mxu1 %v3307_v43  ;;  %3142 = vmatprep.subr.bf16.mxu0 %v3316_v0 }
  0x93   : > { %3120 = vmatprep.subr.bf16.mxu1 %v3309_v32 }
  0x95   : > { %3097 = vmatmul.mubr.msk.bf16.vlgmr.msra.gmra.mxu1 %vm368_vm1, %v3734_v13  ;;  %3143 = vmatpush3.bf16.msra.mxu0 %v3316_v0  ;;  %v3320_v13 = vld [vmem:[#allocation2 + $0x1e8] sm:$0xff]  }
  0x96   : > { %3121 = vmatpush3.bf16.msra.mxu1 %v3309_v32  ;;  %3100 = vmatprep.mubr.msk.bf16.mxu1 %vm368_vm1, %v3648_v1  ;;  %v3317_v1 = vld [vmem:[#allocation2 + $0x1f8] sm:$0xff]  }
  0x97   : > { %3122 = vmatprep.subr.bf16.mxu1 %v3311_v6 }
  0x98   : > { %3145 = vmatmul.mubr.msk.bf16.vlgmr.msra.gmra.mxu0 %vm368_vm1, %v3785_v10  ;;  %v3326_v10 = vld [vmem:[%s4144_s4 + $0x18] sm:$0xff]  }
  0x99   : > { %3148 = vmatprep.mubr.msk.bf16.mxu0 %vm368_vm1, %v3698_v42  ;;  %v3322_v42 = vld [vmem:[%s4144_s4 + $0x38] sm:$0xff]  }
  0x9a   : > { %3123 = vmatpush3.bf16.msra.mxu1 %v3311_v6  ;;  %3168 = vmatprep.subr.bf16.mxu0 %v3322_v42 }
  0x9b   : > { %3124 = vmatprep.subr.bf16.mxu1 %v3313_v30  ;;  %3169 = vmatpush3.bf16.msra.mxu0 %v3322_v42 }
  0x9d   : > { %3101 = vmatmul.mubr.msk.bf16.gmra.mxu1 %vm368_vm1, %v3776_v55  ;;  %v3324_v55 = vld [vmem:[%s4144_s4 + $0x28] sm:$0xff]  }
  0x9e   : > { %3125 = vmatpush3.bf16.msra.mxu1 %v3313_v30  ;;  %3128 = vmatprep.mubr.msk.bf16.mxu1 %vm368_vm1, %v3798_v34 }
  0x9f   : > { %3126 = vmatprep.subr.bf16.mxu1 %v3315_v15 }
  0xa0   : > { %3149 = vmatmul.mubr.msk.bf16.gmra.mxu0 %vm368_vm1, %v3780_v63 }
  0xa2   : > { %3127 = vmatpush3.bf16.msra.mxu1 %v3315_v15 }
  0xa3   : > { %3152 = vmatprep.subr.bf16.mxu1 %v3317_v1 }
  0xa5   : > { %3129 = vmatmul.mubr.msk.bf16.vlgmr.msra.gmra.mxu1 %vm368_vm1, %v3806_v35 }
  0xa6   : > { %3153 = vmatpush3.bf16.msra.mxu1 %v3317_v1  ;;  %3132 = vmatprep.mubr.msk.bf16.mxu1 %vm368_vm1, %v3713_v9  ;;  %v3323_v9 = vld [vmem:[%s4144_s4 + $0x30] sm:$0xff]  }
  0xa7   : > { %3154 = vmatprep.subr.bf16.mxu1 %v3318_v20  ;;  %3170 = vmatprep.subr.bf16.mxu0 %v3323_v9 }
  0xa8   : > { %3171 = vmatpush3.bf16.msra.mxu0 %v3323_v9 }
  0xa9   : > { %3172 = vmatprep.subr.bf16.mxu0 %v3324_v55 }
  0xaa   : > { %3155 = vmatpush3.bf16.msra.mxu1 %v3318_v20 }
  0xab   : > { %3156 = vmatprep.subr.bf16.mxu1 %v3320_v13 }
  0xac   : > { %3173 = vmatpush3.bf16.msra.mxu0 %v3324_v55 }
  0xad   : > { %3133 = vmatmul.mubr.msk.bf16.gmra.mxu1 %vm368_vm1, %v3788_v57 }
  0xae   : > { %3157 = vmatpush3.bf16.msra.mxu1 %v3320_v13  ;;  %3160 = vmatprep.mubr.msk.bf16.mxu1 %vm368_vm1, %v3832_v58 }
  0xaf   : > { %3158 = vmatprep.subr.bf16.mxu1 %v3321_v54 }
  0xb2   : > { %3159 = vmatpush3.bf16.msra.mxu1 %v3321_v54 }
  0xb5   : > { %3161 = vmatmul.mubr.msk.bf16.vlgmr.msra.gmra.mxu1 %vm368_vm1, %v3836_v5 }
  0xb6   : > { %3164 = vmatprep.mubr.msk.bf16.mxu1 %vm368_vm1, %v3739_v18  ;;  %v3325_v18 = vld [vmem:[%s4144_s4 + $0x20] sm:$0xff]  }
  0xb7   : > { %3174 = vmatprep.subr.bf16.mxu0 %v3325_v18 }
  0xb8   : > { %3175 = vmatpush3.bf16.msra.mxu0 %v3325_v18 }
  0xb9   : > { %3176 = vmatprep.subr.bf16.mxu0 %v3326_v10 }
  0xbc   : > { %3177 = vmatpush3.bf16.msra.mxu0 %v3326_v10 }
  0xbd   : > { %3165 = vmatmul.mubr.msk.bf16.gmra.mxu1 %vm368_vm1, %v3802_v3  ;;  %3178 = vmatprep.subr.bf16.mxu0 %v3327_v27 }
  0xc0   : > { %3179 = vmatpush3.bf16.msra.mxu0 %v3327_v27 }
  0xc1   : > { %3180 = vmatprep.subr.bf16.mxu0 %v3328_v28 }
  0xc4   : > { %3181 = vmatpush3.bf16.msra.mxu0 %v3328_v28 }
  0xc5   : > { %3182 = vmatprep.subr.bf16.mxu0 %v3329_v38 }
  0xc8   : > { %3183 = vmatpush3.bf16.msra.mxu0 %v3329_v38 }
  0xf5   : > { %v2922_v63 = vpop.f32.mrf.mxu1 }
  0xf7   : > { %v415_v57 = vpop.f32.mrf.mxu1  ;;  %v2954_v4 = vpop.f32.mrf.mxu0 }
  0xf9   : > { %v2923_v16 = vpop.f32.mrf.mxu1  ;;  %v661_v35 = vpop.f32.mrf.mxu0 }
  0xfb   : > { %v418_v22 = vpop.f32.mrf.mxu1  ;;  %v2955_v8 = vpop.f32.mrf.mxu0 }
  0xfd   : > { %v2926_v23 = vpop.f32.mrf.mxu1  ;;  %v664_v47 = vpop.f32.mrf.mxu0 }
  0xff   : > { %v431_v34 = vpop.f32.mrf.mxu1  ;;  %v2958_v56 = vpop.f32.mrf.mxu0 }
 0x101   : > { %v2927_v3 = vpop.f32.mrf.mxu1  ;;  %v677_v44 = vpop.f32.mrf.mxu0 }
 0x103   : > { %v434_v40 = vpop.f32.mrf.mxu1  ;;  %v2959_v11 = vpop.f32.mrf.mxu0 }
 0x105   : > { %v2938_v46 = vpop.f32.mrf.mxu1  ;;  %v680_v25 = vpop.f32.mrf.mxu0 }
 0x106   : > { %v545_v37 = vadd.f32 %v2938_v46, %v2922_v63 }
 0x107   : > { %v536_v39 = vpop.f32.mrf.mxu1  ;;  %v2986_v12 = vpop.f32.mrf.mxu0 }
 0x108   : > { %v537_v33 = vadd.f32 %v536_v39, %v415_v57  ;;  %v694_v48 = vadd.f32 %v2954_v4, %v545_v37 }
 0x109   : > { %v2939_v41 = vpop.f32.mrf.mxu1  ;;  %v923_v26 = vpop.f32.mrf.mxu0 }
 0x10a   : > { %v548_v24 = vadd.f32 %v2939_v41, %v2923_v16  ;;  %v692_v50 = vadd.f32 %v661_v35, %v537_v33 }
 0x10b   : > { %v539_v51 = vpop.f32.mrf.mxu1  ;;  %v2987_v59 = vpop.f32.mrf.mxu0 }
 0x10c   : > { %v540_v31 = vadd.f32 %v539_v51, %v418_v22  ;;  %v695_v45 = vadd.f32 %v2955_v8, %v548_v24 }
 0x10d   : > { %v2942_v58 = vpop.f32.mrf.mxu1  ;;  %v3927_v52 = vpop.f32.mrf.mxu0 }
 0x10e   : > { %v561_v53 = vadd.f32 %v2942_v58, %v2926_v23  ;;  %v693_v2 = vadd.f32 %v664_v47, %v540_v31 }
 0x10f   : > { %v552_v5 = vpop.f32.mrf.mxu1  ;;  %v2990_v17 = vpop.f32.mrf.mxu0 }
 0x110   : > { %v553_v29 = vadd.f32 %v552_v5, %v431_v34  ;;  %v698_v14 = vadd.f32 %v2958_v56, %v561_v53 }
 0x111   : > { %v2943_v62 = vpop.f32.mrf.mxu1  ;;  %v939_v15 = vpop.f32.mrf.mxu0 }
 0x112   : > { %v564_v19 = vadd.f32 %v2943_v62, %v2927_v3  ;;  %v696_v21 = vadd.f32 %v677_v44, %v553_v29 }
 0x113   : > { %v555_v7 = vpop.f32.mrf.mxu1  ;;  %v2991_v54 = vpop.f32.mrf.mxu0 }
 0x114   : > { %v556_v60 = vadd.f32 %v555_v7, %v434_v40  ;;  %v699_v36 = vadd.f32 %v2959_v11, %v564_v19 }
 0x115   : > { %v2970_v61 = vpop.f32.mrf.mxu1  ;;  %v3931_v18 = vpop.f32.mrf.mxu0 }
 0x116   : > { %v697_v43 = vadd.f32 %v680_v25, %v556_v60  ;;  %v834_v49 = vadd.f32 %v2970_v61, %v694_v48 }
 0x117   : > { %v801_v32 = vpop.f32.mrf.mxu1  ;;  %v3933_v57 = vpop.f32.mrf.mxu0 }
 0x118   : > { %v832_v6 = vadd.f32 %v801_v32, %v692_v50  ;;  %v956_v0 = vadd.f32 %v2986_v12, %v834_v49 }
 0x119   : > { %v2971_v30 = vpop.f32.mrf.mxu1  ;;  %v3935_v23 = vpop.f32.mrf.mxu0 }
 0x11a   : > { %v835_v1 = vadd.f32 %v2971_v30, %v695_v45  ;;  %v954_v20 = vadd.f32 %v923_v26, %v832_v6 }
 0x11b   : > { %v804_v13 = vpop.f32.mrf.mxu1  ;;  %v3937_v3 = vpop.f32.mrf.mxu0 }
 0x11c   : > { %v3929_v42 = vadd.f32 %v804_v13, %v693_v2  ;;  %v957_v9 = vadd.f32 %v2987_v59, %v835_v1 }
 0x11d   : > { %v2974_v55 = vpop.f32.mrf.mxu1  ;;  %v3941_v38 = vpop.f32.mrf.mxu0 }
 0x11e   : > { %v838_v63 = vadd.f32 %v2974_v55, %v698_v14 }
 0x11f   : > { %v817_v10 = vpop.f32.mrf.mxu1 }
 0x120   : > { %v836_v16 = vadd.f32 %v817_v10, %v696_v21  ;;  %v960_v22 = vadd.f32 %v2990_v17, %v838_v63  ;;  %v3943_v37 = vpop.f32.mrf.mxu0 }
 0x121   : > { %v2975_v27 = vpop.f32.mrf.mxu1 }
 0x122   : > { %v839_v34 = vadd.f32 %v2975_v27, %v699_v36  ;;  %v958_v4 = vadd.f32 %v939_v15, %v836_v16  ;;  %v3945_v33 = vpop.f32.mrf.mxu0 }
 0x123   : > { %v820_v28 = vpop.f32.mrf.mxu1 }
 0x124   : > { %v3939_v35 = vadd.f32 %v820_v28, %v697_v43  ;;  %v961_v40 = vadd.f32 %v2991_v54, %v839_v34  ;;  %v3947_v44 = vpop.f32.mrf.mxu0 }
 0x125   : > { %v3002_v8 = vpop.f32.mrf.mxu1 }
 0x126   : > { %v1107_v46 = vadd.f32 %v3002_v8, %v956_v0  ;;  %v3949_v50 = vpop.f32.mrf.mxu0 }
 0x127   : > { %v1074_v47 = vpop.f32.mrf.mxu1 }
 0x128   : > { %v1105_v39 = vadd.f32 %v1074_v47, %v954_v20  ;;  %v3050_v31 = vpop.f32.mrf.mxu0 }
 0x129   : > { %v3003_v56 = vpop.f32.mrf.mxu1 }
 0x12a   : > { %v1108_v48 = vadd.f32 %v3003_v56, %v957_v9  ;;  %v3955_v25 = vpop.f32.mrf.mxu0 }
 0x12b   : > { %v1077_v41 = vpop.f32.mrf.mxu1 }
 0x12c   : > { %v3959_v5 = vpop.f32.mrf.mxu0 }
 0x12d   : > { %v3006_v24 = vpop.f32.mrf.mxu1 }
 0x12e   : > { %v3951_v51 = vadd.f32 %v3006_v24, %v960_v22  ;;  %v3961_v29 = vpop.f32.mrf.mxu0 }
 0x12f   : > { %v1090_v11 = vpop.f32.mrf.mxu1 }
 0x130   : > { %v3953_v45 = vadd.f32 %v1090_v11, %v958_v4  ;;  %v3963_v62 = vpop.f32.mrf.mxu0 }
 0x131   : > { %v3007_v58 = vpop.f32.mrf.mxu1 }
 0x132   : > { %v3957_v53 = vadd.f32 %v3007_v58, %v961_v40  ;;  %v3965_v19 = vpop.f32.mrf.mxu0  ;;  %v1239_v58 = vadd.f32 %v3933_v57, %v1107_v46  ;;  %v959_v57 = vadd.f32 %v3931_v18, %v3939_v35 }
 0x133   : > { %v1093_v2 = vpop.f32.mrf.mxu1 }
 0x134   : > { %v3967_v7 = vpop.f32.mrf.mxu0 }
 0x135   : > { %v3034_v12 = vpop.f32.mrf.mxu1 }
 0x136   : > { %v3969_v60 = vpop.f32.mrf.mxu0 }
 0x137   : > { %v1345_v14 = vpop.f32.mrf.mxu1 }
 0x138   : > { %v3082_v61 = vpop.f32.mrf.mxu0 }
 0x139   : > { %v3035_v26 = vpop.f32.mrf.mxu1 }
 0x13a   : > { %v3973_v49 = vpop.f32.mrf.mxu0 }
 0x13b   : > { %v1348_v21 = vpop.f32.mrf.mxu1 }
 0x13c   : > { %v3977_v17 = vpop.f32.mrf.mxu0 }
 0x13d   : > { %v3038_v59 = vpop.f32.mrf.mxu1 }
 0x13e   : > { %v3979_v0 = vpop.f32.mrf.mxu0 }
 0x13f   : > { %v1361_v36 = vpop.f32.mrf.mxu1 }
 0x140   : > { %v3981_v15 = vpop.f32.mrf.mxu0 }
 0x141   : > { %v3971_v43 = vpop.f32.mrf.mxu1  ;;  %4150 = vst [vmem:[#allocation8_spill] sm:$0xff] %v3981_v15 }
 0x142   : > { %v3983_v20 = vpop.f32.mrf.mxu0 }
 0x143   : > { %v3975_v32 = vpop.f32.mrf.mxu1  ;;  %4151 = vst [vmem:[#allocation9_spill] sm:$0xff] %v3983_v20  ;;  %v1378_v20 = vadd.f32 %v3034_v12, %v1239_v58  ;;  %v1241_v12 = vadd.f32 %v3945_v33, %v3953_v45 }
 0x144   : > { %v3985_v54 = vpop.f32.mrf.mxu0 }
 0x145   : > { %v3066_v6 = vpop.f32.mrf.mxu1  ;;  %4152 = vst [vmem:[#allocation10_spill] sm:$0xff] %v3985_v54 }
 0x146   : > { %v3987_v55 = vpop.f32.mrf.mxu0 }
 0x147   : > { %v1578_v30 = vpop.f32.mrf.mxu1  ;;  %4153 = vst [vmem:[#allocation11_spill] sm:$0xff] %v3987_v55  ;;  %v955_v55 = vadd.f32 %v3927_v52, %v3929_v42  ;;  %v1492_v52 = vadd.f32 %v3050_v31, %v1378_v20  ;;  %v1380_v20 = vadd.f32 %v1361_v36, %v1241_v12 }
 0x148   : > { %v3991_v10 = vpop.f32.mrf.mxu0 }
 0x149   : > { %v3067_v1 = vpop.f32.mrf.mxu1 }
 0x14a   : > { %v3995_v22 = vpop.f32.mrf.mxu0 }
 0x14b   : > { %v1581_v13 = vpop.f32.mrf.mxu1  ;;  %4154 = vst [vmem:[#allocation12_spill] sm:$0xff] %v3995_v22 }
 0x14c   : > { %v3999_v34 = vpop.f32.mrf.mxu0 }
 0x14d   : > { %v3070_v9 = vpop.f32.mrf.mxu1  ;;  %4155 = vst [vmem:[#allocation13_spill] sm:$0xff] %v3999_v34 }
 0x14e   : > { %v4001_v28 = vpop.f32.mrf.mxu0 }
 0x14f   : > { %v3989_v63 = vpop.f32.mrf.mxu1  ;;  %4156 = vst [vmem:[#allocation14_spill] sm:$0xff] %v4001_v28  ;;  %v1237_v28 = vadd.f32 %v3935_v23, %v1105_v39  ;;  %v1243_v39 = vadd.f32 %v3943_v37, %v3951_v51 }
 0x150   : > { %v4003_v8 = vpop.f32.mrf.mxu0 }
 0x151   : > { %v3993_v16 = vpop.f32.mrf.mxu1  ;;  %4157 = vst [vmem:[#allocation15_spill] sm:$0xff] %v4003_v8  ;;  %v1106_v8 = vadd.f32 %v1077_v41, %v955_v55  ;;  %v1382_v31 = vadd.f32 %v3038_v59, %v1243_v39 }
 0x152   : > { %v4005_v56 = vpop.f32.mrf.mxu0 }
 0x153   : > { %v3997_v27 = vpop.f32.mrf.mxu1  ;;  %4158 = vst [vmem:[#allocation16_spill] sm:$0xff] %v4005_v56  ;;  %v1240_v56 = vadd.f32 %v3937_v3, %v1108_v48  ;;  %v1611_v3 = vadd.f32 %v3066_v6, %v1492_v52 }
 0x154   : > { %v4009_v11 = vpop.f32.mrf.mxu0 }
 0x155   : > { %v3098_v4 = vpop.f32.mrf.mxu1  ;;  %4160 = vst [vmem:[#allocation18_spill] sm:$0xff] %v4009_v11  ;;  %v1379_v42 = vadd.f32 %v3035_v26, %v1240_v56  ;;  %v1110_v11 = vadd.f32 %v1093_v2, %v959_v57  ;;  %v1727_v51 = vadd.f32 %v3082_v61, %v1611_v3 }
 0x156   : > { %v4016_v34 = vpop.f32.mrf.mxu0 }
 0x157   : > { %v1813_v40 = vpop.f32.mrf.mxu1  ;;  %4161 = vst [vmem:[#allocation19_spill] sm:$0xff] %v4016_v34  ;;  %v1238_v34 = vadd.f32 %v3941_v38, %v1106_v8  ;;  %v1493_v35 = vadd.f32 %v3959_v5, %v1379_v42  ;;  %v1244_v38 = vadd.f32 %v3947_v44, %v3957_v53  ;;  %v1242_v2 = vadd.f32 %v3949_v50, %v1110_v11  ;;  %v4163_v8 = vld [vmem:[#allocation12_spill] sm:$0xff] }
 0x158   : > { %v4022_v15 = vpop.f32.mrf.mxu0  ;;  %v1496_v5 = vadd.f32 %v3963_v62, %v1382_v31  ;;  %v1494_v44 = vadd.f32 %v3965_v19, %v1380_v20  ;;  %v4170_v20 = vld [vmem:[#allocation15_spill] sm:$0xff] }
 0x159   : > { %v3099_v47 = vpop.f32.mrf.mxu1  ;;  %v1383_v33 = vadd.f32 %v3971_v43, %v1244_v38  ;;  %v1381_v45 = vadd.f32 %v3975_v32, %v1242_v2 }
 0x15a   : > { %v2154_v48 = vpop.f32.mrf.mxu0  ;;  %v1615_v61 = vadd.f32 %v3070_v9, %v1496_v5  ;;  %v1613_v32 = vadd.f32 %v3989_v63, %v1494_v44  ;;  %v4162_v9 = vld [vmem:[#allocation8_spill] sm:$0xff] }
 0x15b   : > { %v4007_v24 = vpop.f32.mrf.mxu1  ;;  %v1495_v43 = vadd.f32 %v3969_v60, %v1381_v45  ;;  %v4164_v60 = vld [vmem:[#allocation9_spill] sm:$0xff] }
 0x15c   : > { %4159 = vst [vmem:[#allocation17_spill] sm:$0xff] %v4007_v24  ;;  %v1376_v24 = vadd.f32 %v1345_v14, %v1237_v28  ;;  %v1377_v14 = vadd.f32 %v1348_v21, %v1238_v34  ;;  %v3147_v6 = vpop.f32.mrf.mxu0  ;;  %v1729_v11 = vadd.f32 %v4164_v60, %v1613_v32 }
 0x15d   : > { %v4014_v54 = vpop.f32.mrf.mxu1 }
 0x15e   : > { %v1490_v41 = vadd.f32 %v3955_v25, %v1376_v24  ;;  %v1612_v25 = vadd.f32 %v3067_v1, %v1493_v35  ;;  %v1491_v55 = vadd.f32 %v3961_v29, %v1377_v14  ;;  %v2157_v34 = vpop.f32.mrf.mxu0  ;;  %v1497_v29 = vadd.f32 %v3967_v7, %v1383_v33  ;;  %v4169_v35 = vld [vmem:[#allocation14_spill] sm:$0xff]  ;;  %v2756_v33 = vld [vmem:[%s4143_s3] ss:$0 sm:$0xff] }
 0x15f   : > { %v4019_v22 = vpop.f32.mrf.mxu1 }
 0x160   : > { %v1609_v26 = vadd.f32 %v1578_v30, %v1490_v41  ;;  %v1846_v30 = vadd.f32 %v3098_v4, %v1727_v51  ;;  %v1610_v50 = vadd.f32 %v1581_v13, %v1491_v55  ;;  %v1728_v36 = vadd.f32 %v3977_v17, %v1612_v25  ;;  %v3150_v24 = vpop.f32.mrf.mxu0  ;;  %v4171_v25 = vld [vmem:[#allocation16_spill] sm:$0xff] }
 0x161   : > { %v4026_v46 = vpop.f32.mrf.mxu1  ;;  %v1616_v19 = vadd.f32 %v3993_v16, %v1497_v29  ;;  %v1614_v13 = vadd.f32 %v3997_v27, %v1495_v43  ;;  %v4167_v16 = vld [vmem:[#allocation10_spill] sm:$0xff]  ;;  %v4168_v27 = vld [vmem:[#allocation11_spill] sm:$0xff]  ;;  %v1848_v41 = vadd.f32 %v4019_v22, %v1729_v11 }
 0x162   : > { %v1725_v59 = vadd.f32 %v3973_v49, %v1609_v26  ;;  %v1952_v62 = vadd.f32 %v3991_v10, %v1846_v30  ;;  %v1847_v49 = vadd.f32 %v3099_v47, %v1728_v36  ;;  %v1726_v4 = vadd.f32 %v3979_v0, %v1610_v50  ;;  %v4166_v10 = vld [vmem:[#allocation13_spill] sm:$0xff]  ;;  %v4172_v30 = vld [vmem:[#allocation18_spill] sm:$0xff]  ;;  %v4173_v50 = vld [vmem:[#allocation19_spill] sm:$0xff] }
 0x163   : > { %v1832_v23 = vpop.f32.mrf.mxu1  ;;  %v4165_v63 = vld [vmem:[#allocation17_spill] sm:$0xff]  ;;  %v1732_v42 = vadd.f32 %v4167_v16, %v1616_v19  ;;  %v1730_v39 = vadd.f32 %v4168_v27, %v1614_v13  ;;  %v1954_v55 = vadd.f32 %v4171_v25, %v1848_v41 }
 0x164   : > { %v1844_v1 = vadd.f32 %v1813_v40, %v1725_v59  ;;  %v1731_v40 = vadd.f32 %v4162_v9, %v1615_v61  ;;  %v1845_v58 = vadd.f32 %v4165_v63, %v1726_v4  ;;  %v1953_v47 = vadd.f32 %v4166_v10, %v1847_v49 }
 0x165   : > { %v3130_v18 = vpop.f32.mrf.mxu1  ;;  %v1851_v26 = vadd.f32 %v4026_v46, %v1732_v42  ;;  %v1849_v38 = vadd.f32 %v1832_v23, %v1730_v39 }
 0x166   : > { %v1950_v56 = vadd.f32 %v4163_v8, %v1844_v1  ;;  %v2071_v7 = vadd.f32 %v3130_v18, %v1952_v62  ;;  %v1850_v0 = vadd.f32 %v4014_v54, %v1731_v40  ;;  %v2170_v18 = vpop.f32.mrf.mxu0  ;;  %v1951_v31 = vadd.f32 %v4169_v35, %v1845_v58  ;;  %v4067_v54 = vld [vmem:[%s4142_s2] ss:$0 sm:$0xff] }
 0x167   : > { %v2038_v37 = vpop.f32.mrf.mxu1  ;;  %v1957_v44 = vadd.f32 %v4172_v30, %v1851_v26  ;;  %v1955_v36 = vadd.f32 %v4173_v50, %v1849_v38 }
 0x168   : > { %v2069_v52 = vadd.f32 %v2038_v37, %v1950_v56  ;;  %v2187_v12 = vadd.f32 %v4022_v15, %v2071_v7  ;;  %v1956_v37 = vadd.f32 %v4170_v20, %v1850_v0 }
 0x169   : > { %v3131_v21 = vpop.f32.mrf.mxu1 }
 0x16a   : > { %v2072_v14 = vadd.f32 %v3131_v21, %v1953_v47  ;;  %v2185_v51 = vadd.f32 %v2154_v48, %v2069_v52  ;;  %v3151_v21 = vpop.f32.mrf.mxu0 }
 0x16b   : > { %v2041_v53 = vpop.f32.mrf.mxu1 }
 0x16c   : > { %v2070_v15 = vadd.f32 %v2041_v53, %v1951_v31  ;;  %v2188_v46 = vadd.f32 %v3147_v6, %v2072_v14 }
 0x16d   : > { %v3134_v28 = vpop.f32.mrf.mxu1 }
 0x16e   : > { %v2075_v23 = vadd.f32 %v3134_v28, %v1956_v37  ;;  %v2186_v43 = vadd.f32 %v2157_v34, %v2070_v15  ;;  %v2173_v28 = vpop.f32.mrf.mxu0 }
 0x16f   : > { %v2054_v17 = vpop.f32.mrf.mxu1 }
 0x170   : > { %v2073_v61 = vadd.f32 %v2054_v17, %v1954_v55  ;;  %v2191_v6 = vadd.f32 %v3150_v24, %v2075_v23 }
 0x171   : > { %v3135_v57 = vpop.f32.mrf.mxu1 }
 0x172   : > { %v2076_v32 = vadd.f32 %v3135_v57, %v1957_v44  ;;  %v2189_v8 = vadd.f32 %v2170_v18, %v2073_v61 }
 0x173   : > { %v2057_v3 = vpop.f32.mrf.mxu1 }
 0x174   : > { %v2074_v62 = vadd.f32 %v2057_v3, %v1955_v36  ;;  %v2192_v7 = vadd.f32 %v3151_v21, %v2076_v32 }
 0x175   : > { %v3162_v2 = vpop.f32.mrf.mxu1 }
 0x176   : > { %v2306_v22 = vadd.f32 %v3162_v2, %v2187_v12  ;;  %v2190_v60 = vadd.f32 %v2173_v28, %v2074_v62 }
 0x177   : > { %v2273_v45 = vpop.f32.mrf.mxu1 }
 0x178   : > { %v2321_v5 = vmul.f32 %v4067_v54, %v2306_v22  ;;  %v2304_v59 = vadd.f32 %v2273_v45, %v2185_v51 }
 0x179   : > { %v3163_v48 = vpop.f32.mrf.mxu1 }
 0x17a   : > { %v2336_v1 = vadd.f32 %v2756_v33, %v2321_v5  ;;  %v2319_v53 = vmul.f32 %v4067_v54, %v2304_v59  ;;  %v2307_v29 = vadd.f32 %v3163_v48, %v2188_v46 }
 0x17b   : > { %v2276_v49 = vpop.f32.mrf.mxu1 }
 0x17c   : > { %v2322_v4 = vmul.f32 %v4067_v54, %v2307_v29  ;;  %v2352_v19 = vmul.f32 0.01, %v2336_v1  ;;  %v2334_v13 = vadd.f32 %v2756_v33, %v2319_v53  ;;  %v2305_v9 = vadd.f32 %v2276_v49, %v2186_v43 }
 0x17d   : > { %v3166_v40 = vpop.f32.mrf.mxu1  ;;  %vm2344_vm4 = vcmp.ge.f32.partialorder %v2336_v1, 0.0 }
 0x17e   : > { %v2337_v56 = vadd.f32 %v2756_v33, %v2322_v4  ;;  %v2310_v17 = vadd.f32 %v3166_v40, %v2191_v6  ;;  %v2320_v11 = vmul.f32 %v4067_v54, %v2305_v9  ;;  %v2360_v57 = vsel %vm2344_vm4, %v2336_v1, %v2352_v19 }
 0x17f   : > { %v2289_v34 = vpop.f32.mrf.mxu1  ;;  %v2350_v10 = vmul.f32 0.01, %v2334_v13  ;;  %vm2342_vm6 = vcmp.ge.f32.partialorder %v2334_v13, 0.0 }
 0x180   : > { %vm2345_vm5 = vcmp.ge.f32.partialorder %v2337_v56, 0.0  ;;  %v2353_v63 = vmul.f32 0.01, %v2337_v56  ;;  %v2325_v24 = vmul.f32 %v4067_v54, %v2310_v17  ;;  %v2308_v58 = vadd.f32 %v2289_v34, %v2189_v8 }
 0x181   : > { %v2335_v47 = vadd.f32 %v2756_v33, %v2320_v11  ;;  %v3167_v0 = vpop.f32.mrf.mxu1  ;;  %v2358_v35 = vsel %vm2342_vm6, %v2334_v13, %v2350_v10 }
 0x182   : > { %v2361_v52 = vsel %vm2345_vm5, %v2337_v56, %v2353_v63  ;;  %v2340_v16 = vadd.f32 %v2756_v33, %v2325_v24  ;;  %v2323_v42 = vmul.f32 %v4067_v54, %v2308_v58  ;;  %v2311_v27 = vadd.f32 %v3167_v0, %v2192_v7 }
 0x183   : > { %v2367_v39 = vpack.c.bf16 %v2361_v52, %v2360_v57  ;;  %v2351_v41 = vmul.f32 0.01, %v2335_v47  ;;  %v2292_v3 = vpop.f32.mrf.mxu1  ;;  %vm2343_vm7 = vcmp.ge.f32.partialorder %v2335_v47, 0.0 }
 0x184   : > { %v2338_v12 = vadd.f32 %v2756_v33, %v2323_v42  ;;  %v2326_v14 = vmul.f32 %v4067_v54, %v2311_v27  ;;  %v2309_v18 = vadd.f32 %v2292_v3, %v2190_v60  ;;  %v2356_v26 = vmul.f32 0.01, %v2340_v16 }
 0x185   : > { %v2359_v31 = vsel %vm2343_vm7, %v2335_v47, %v2351_v41  ;;  %vm2348_vm8 = vcmp.ge.f32.partialorder %v2340_v16, 0.0 }
 0x186   : > { %v2341_v38 = vadd.f32 %v2756_v33, %v2326_v14  ;;  %v2324_v2 = vmul.f32 %v4067_v54, %v2309_v18  ;;  %v2366_v20 = vpack.c.bf16 %v2359_v31, %v2358_v35  ;;  %v2354_v37 = vmul.f32 0.01, %v2338_v12  ;;  %v2757_v54 = vld [vmem:[%s4145_s5] ss:$0 sm:$0xff] }
 0x187   : > { %vm2346_vm10 = vcmp.ge.f32.partialorder %v2338_v12, 0.0  ;;  %v2364_v55 = vsel %vm2348_vm8, %v2340_v16, %v2356_v26 }
 0x188   : > { %v2357_v51 = vmul.f32 0.01, %v2341_v38  ;;  %v2339_v22 = vadd.f32 %v2756_v33, %v2324_v2  ;;  %3184 = vmatprep.mubr.bf16.mxu0 %v2366_v20  ;;  %vm2349_vm9 = vcmp.ge.f32.partialorder %v2341_v38, 0.0  ;;  %v2362_v46 = vsel %vm2346_vm10, %v2338_v12, %v2354_v37 }
 0x189   : > { %3185 = vmatmul.mubr.bf16.vlgmr.msra.gmra.mxu0 %v2367_v39 }
 0x18a   : > { %v2355_v25 = vmul.f32 0.01, %v2339_v22  ;;  %vm2347_vm11 = vcmp.ge.f32.partialorder %v2339_v22, 0.0  ;;  %v2365_v15 = vsel %vm2349_vm9, %v2341_v38, %v2357_v51 }
 0x18b   : > { %v2369_v45 = vpack.c.bf16 %v2365_v15, %v2364_v55 }
 0x18c   : > { %v2363_v23 = vsel %vm2347_vm11, %v2339_v22, %v2355_v25 }
 0x18d   : > { %v2368_v21 = vpack.c.bf16 %v2363_v23, %v2362_v46 }
 0x18f   : > { %3188 = vmatprep.mubr.bf16.mxu0 %v2368_v21 }
 0x191   : > { %3189 = vmatmul.mubr.bf16.gmra.mxu0 %v2369_v45 }
 0x249   : > { %v3186_v33 = vpop.f32.mrf.mxu0 }
 0x24a   : > { %v2484_v5 = vadd.f32 %v3186_v33, %v2757_v54 }
 0x24b   : > { %v2475_v59 = vpop.f32.mrf.mxu0 }
 0x24c   : > { %2508 = vst [vmem:[%s260_s16 + $0x10] sm:$0xff] %v2484_v5  ;;  %v2476_v30 = vadd.f32 %v2757_v54, %v2475_v59 }
 0x24d   : > { %v3187_v44 = vpop.f32.mrf.mxu0 }
 0x24e   : > { %2506 = vst [vmem:[%s260_s16] sm:$0xff] %v2476_v30  ;;  %v2487_v50 = vadd.f32 %v3187_v44, %v2757_v54 }
 0x24f   : > { %v2478_v36 = vpop.f32.mrf.mxu0 }
 0x250   : > { %2509 = vst [vmem:[%s260_s16 + $0x18] sm:$0xff] %v2487_v50  ;;  %v2479_v48 = vadd.f32 %v2757_v54, %v2478_v36 }
 0x251   : > { %v3190_v61 = vpop.f32.mrf.mxu0 }
 0x252   : > { %2507 = vst [vmem:[%s260_s16 + $0x8] sm:$0xff] %v2479_v48  ;;  %v2500_v1 = vadd.f32 %v3190_v61, %v2757_v54 }
 0x253   : > { %v2491_v53 = vpop.f32.mrf.mxu0 }
 0x254   : > { %2512 = vst [vmem:[%s260_s16 + $0x30] sm:$0xff] %v2500_v1  ;;  %v2492_v29 = vadd.f32 %v2757_v54, %v2491_v53 }
 0x255   : > { %v3191_v43 = vpop.f32.mrf.mxu0 }
 0x256   : > { %2510 = vst [vmem:[%s260_s16 + $0x20] sm:$0xff] %v2492_v29  ;;  %v2503_v32 = vadd.f32 %v3191_v43, %v2757_v54 }
 0x257   : > { %v2494_v62 = vpop.f32.mrf.mxu0 }
 0x258   : > { %2513 = vst [vmem:[%s260_s16 + $0x38] sm:$0xff] %v2503_v32  ;;  %v2495_v49 = vadd.f32 %v2757_v54, %v2494_v62 }
 0x25a   : > { %2511 = vst [vmem:[%s260_s16 + $0x28] sm:$0xff] %v2495_v49 }
 0x25b   : > { %3369 = shalt.err (!%p3366_p0)
}
 0x25c   : > { %s3370_s11 = scalar_lea.hbm %s4096_s26, 1024  ;;  %s3374_s14 = scalar_lea.hbm %s4146_s6, 2048 }
 0x25d   : > { %p3371_p1 = scmp.ne.s32.totalorder %s4096_s26, %s3370_s11  ;;  %p3375_p4 = scmp.lt.s32.totalorder %s4096_s26, %s4146_s6 }
 0x25e   : > { %p3376_p7 = scmp.lt.s32.totalorder %s3374_s14, %s3370_s11 }
 0x25f   : > { %p3372_p2 = pnand %p3371_p1, %p3501_p5 }
 0x260   : > { %p3377_p8 = por %p3376_p7, %p3375_p4 }
 0x261   : > { %p3373_p3 = pneg %p3372_p2 }
 0x263   : > { %p3378_p6 = pnand %p3377_p8, %p3373_p3 }
 0x265   : > { %3381 = shalt.err (!%p3378_p6)
}
 0x266   : > { %s3426_s18 = smov 128   ;;  %s3427_s19 = smov 8  }
 0x267   : > { %3196 = dma.vmem_to_hbm [thread:$0]  (%p3501_p5), %s4091_s17, 1024, %s4096_s26, %s4100_s28, %s3426_s18, %s3426_s18, %s3427_s19  }
 0x268 PF: > { %p3208_p9 = scmp.ge.s32.totalorder %s3420_s24, 2  ;;  %s2543_s20 = sand.u32 1, %s3408_s21  }
 0x269   : > { %p4174_p10 = scmp.ne.s32.totalorder %s4148_s8, 0  ;;  %s2544_s25 = scalar_lea.sflag [#allocation4], %s2543_s20 }
 0x26b   : > { %p3203_p11 = pnand %p3208_p9, %p4174_p10 }
 0x26d   : > { %p3204_p12 = pneg %p3203_p11 }
 0x26f   : > { %3403 = dma.done.wait (%p3204_p12), %s2544_s25, 1024  }
 0x270   : > { %3405 = vsyncadd (%p3204_p12), %s2544_s25, 4294966272  ;;  %p17_p13 = scmp.ge.s32.totalorder %s3488_s27, 4   ;;  %s4175_s21 = smov %s3412_s22 }
 0x271   : > { %s4176_s22 = smov %s3416_s23  ;;  %s4177_s23 = smov %s3499_s30 }
 0x272   : > { %s4178_s24 = smov %s3488_s27  ;;  %19 = sbr.rel (!%p17_p13) target bundleno = 4 (0x4), region = 99 }
 0x277   :  { %2549 = vsyncpa [#allocation3], 1 }
 0x278   :  { %2551 = vsyncpa [#allocation3 + $0x1], 1 }
 0x279   :  { %2552 = vsyncpa [#allocation4], 1 }
 0x27a   :  { %2554 = vsyncpa [#allocation4 + $0x1], 1 }

</bundles_post_ra>
